<compile_context>
chip_gen: v7x
topology: tpu7x:2x2x1
jax: 0.10.0
libtpu: 0.0.40
codegen_flags: <defaults>
</compile_context>

<pallas_src>
import functools

import jax
import jax.numpy as jnp
from jax.experimental import pallas as pl
from jax.experimental.pallas import tpu as pltpu

_VMEM = pl.BlockSpec(memory_space=pltpu.MemorySpace.VMEM)
_LANES = 128


# ---------------------------------------------------------------------------
# Pallas kernels
# ---------------------------------------------------------------------------
def _conv_relu_pool_kernel(p_ref, w_ref, b_ref, o_ref):
    """Fused conv-as-GEMM + bias + ReLU + 2x2 max-pool.

    p_ref: (4, M, K) bf16  -- im2col patches grouped by pool-window parity
    w_ref: (K, 128) bf16   -- conv weights, OC zero-padded to 128 lanes
    b_ref: (1, 128) f32    -- bias, zero-padded
    o_ref: (M, 128) bf16   -- pooled activations, M = N*PH*PW (lane-dense)
    """
    w = w_ref[...]
    acc = jnp.dot(p_ref[0], w, preferred_element_type=jnp.float32)
    for i in range(1, 4):  # max over the 4 pool-window positions
        acc = jnp.maximum(
            acc, jnp.dot(p_ref[i], w, preferred_element_type=jnp.float32))
    acc = jnp.maximum(acc + b_ref[...], 0.0)  # relu(max(.)+b) == pool(relu(.))
    o_ref[...] = acc.astype(o_ref.dtype)


def _fc_chain_kernel(x_ref, w1_ref, b1_ref, w2_ref, b2_ref, w3_ref, b3_ref,
                     o_ref):
    """fc1 -> ReLU -> fc2 -> ReLU -> fc3, fused; hidden dims padded to 128."""
    h = jnp.dot(x_ref[...], w1_ref[...], preferred_element_type=jnp.float32)
    h = jnp.maximum(h + b1_ref[...], 0.0).astype(jnp.bfloat16)
    h = jnp.dot(h, w2_ref[...], preferred_element_type=jnp.float32)
    h = jnp.maximum(h + b2_ref[...], 0.0).astype(jnp.bfloat16)
    h = jnp.dot(h, w3_ref[...], preferred_element_type=jnp.float32)
    o_ref[...] = (h + b3_ref[...]).astype(o_ref.dtype)


# ---------------------------------------------------------------------------
# Wrappers
# ---------------------------------------------------------------------------
def _pooled_patches(x_nhwc, k):
    """im2col with rows grouped by 2x2 pool-window parity.

    Returns (4, N*PH*PW, C*k*k); feature order c*k*k + kh*k + kw matches
    PyTorch weight.reshape(OC, C*k*k).
    """
    n, h, w, c = x_nhwc.shape
    oh, ow = h - k + 1, w - k + 1
    ph, pw = oh // 2, ow // 2
    cols = []
    for kh in range(k):
        for kw in range(k):
            cols.append(x_nhwc[:, kh:kh + oh, kw:kw + ow, :])  # (N,OH,OW,C)
    pat = jnp.stack(cols, axis=-1)                      # (N, OH, OW, C, k*k)
    par = jnp.stack([pat[:, 0::2, 0::2], pat[:, 0::2, 1::2],
                     pat[:, 1::2, 0::2], pat[:, 1::2, 1::2]], axis=0)
    return par.reshape(4, n * ph * pw, c * k * k), (n, ph, pw)


def conv_relu_pool(x_nhwc, w_pad, b_pad, k):
    pat, (n, ph, pw) = _pooled_patches(x_nhwc, k)
    m = n * ph * pw
    out = pl.pallas_call(
        _conv_relu_pool_kernel,
        out_shape=jax.ShapeDtypeStruct((m, _LANES), jnp.bfloat16),
        in_specs=[_VMEM, _VMEM, _VMEM],
        out_specs=_VMEM,
    )(pat, w_pad, b_pad)
    return out.reshape(n, ph, pw, _LANES)


def fc_chain(x, p):
    n = x.shape[0]
    num_classes = p["fw3"].shape[1]
    return pl.pallas_call(
        _fc_chain_kernel,
        out_shape=jax.ShapeDtypeStruct((n, num_classes), jnp.float32),
        in_specs=[_VMEM] * 7,
        out_specs=_VMEM,
    )(x, p["fw1"], p["fb1"], p["fw2"], p["fb2"], p["fw3"], p["fb3"])


# ---------------------------------------------------------------------------
# Parameters (deterministic, PyTorch-default-style uniform init) + one-time prep
# ---------------------------------------------------------------------------
def init_params(key, num_classes=10):
    ks = jax.random.split(key, 10)

    def u(k, shape, fan_in):
        bound = 1.0 / jnp.sqrt(jnp.float32(fan_in))
        return jax.random.uniform(k, shape, jnp.float32, -bound, bound)

    return {
        "w1": u(ks[0], (6, 3, 5, 5), 3 * 25),
        "b1": u(ks[1], (6,), 3 * 25),
        "w2": u(ks[2], (16, 6, 5, 5), 6 * 25),
        "b2": u(ks[3], (16,), 6 * 25),
        "fw1": u(ks[4], (400, 120), 400),
        "fb1": u(ks[5], (120,), 400),
        "fw2": u(ks[6], (120, 84), 120),
        "fb2": u(ks[7], (84,), 120),
        "fw3": u(ks[8], (84, num_classes), 84),
        "fb3": u(ks[9], (num_classes,), 84),
    }


def prepare_params(p):
    """One-time weight prep: reshape/transpose, zero-pad to 128 lanes, bf16."""
    def pad_to(a, rows, cols):
        return jnp.pad(a, ((0, rows - a.shape[0]), (0, cols - a.shape[1])))

    nc = p["fw3"].shape[1]
    return {
        # conv weights: (OC, C, k, k) -> (C*k*k, 128), zero-padded lanes
        "w1": pad_to(p["w1"].reshape(6, -1).T, 75, _LANES).astype(jnp.bfloat16),
        "b1": pad_to(p["b1"].reshape(1, 6), 1, _LANES),
        "w2": pad_to(p["w2"].reshape(16, -1).T, 150, _LANES).astype(jnp.bfloat16),
        "b2": pad_to(p["b2"].reshape(1, 16), 1, _LANES),
        # fc weights: hidden dims zero-padded to 128 so the fused chain stays
        # lane-dense end to end (padding contributes exactly zero).
        "fw1": pad_to(p["fw1"], 400, _LANES).astype(jnp.bfloat16),
        "fb1": pad_to(p["fb1"].reshape(1, -1), 1, _LANES),
        "fw2": pad_to(p["fw2"], _LANES, _LANES).astype(jnp.bfloat16),
        "fb2": pad_to(p["fb2"].reshape(1, -1), 1, _LANES),
        "fw3": pad_to(p["fw3"], _LANES, nc).astype(jnp.bfloat16),
        "fb3": p["fb3"].reshape(1, -1),
    }


# ---------------------------------------------------------------------------
# Forward (reg='none' branch of LeNet.forward)
# ---------------------------------------------------------------------------
# TODO(synk): reg='bn' and reg='dropout' branches (BatchNorm / Dropout) are not
# exercised by the default reg='none' forward and are not implemented here.
def lenet_forward(params, x_nchw):
    x = jnp.transpose(x_nchw, (0, 2, 3, 1)).astype(jnp.bfloat16)    # NHWC bf16
    x = conv_relu_pool(x, params["w1"], params["b1"], 5)            # (N,14,14,128), ch 0..5 valid
    x = conv_relu_pool(x[..., :6], params["w2"], params["b2"], 5)   # (N,5,5,128), ch 0..15 valid
    n = x.shape[0]
    # x.view(N, -1) in NCHW order
    x = jnp.transpose(x[..., :16], (0, 3, 1, 2)).reshape(n, 16 * 5 * 5)
    return fc_chain(x, params)                                      # (N, num_classes) f32


if __name__ == "__main__":
    key = jax.random.PRNGKey(0)
    pkey, xkey = jax.random.split(key)
    params = prepare_params(init_params(pkey, num_classes=10))
    # LeNet's fc1 (16*5*5) implies 32x32 spatial input (CIFAR); batch kept small.
    x = jax.random.normal(xkey, (2, 3, 32, 32), dtype=jnp.float32)

    out = jax.jit(lenet_forward)(params, x)
    out = jax.block_until_ready(out)
    assert out.shape == (2, 10), out.shape
    print("KERNEL_OK")
</pallas_src>

<mosaic_0001>
module attributes {stable_mosaic.version = 11 : i64} {
  func.func @_conv_relu_pool_kernel(%arg0: memref<4x392x75xbf16, #tpu.memory_space<vmem>>, %arg1: memref<75x128xbf16, #tpu.memory_space<vmem>>, %arg2: memref<1x128xf32, #tpu.memory_space<vmem>>, %arg3: memref<392x128xbf16, #tpu.memory_space<vmem>>) attributes {dimension_semantics = [], scalar_prefetch = 0 : i64, scratch_operands = 0 : i64, tpu.core_type = #tpu.core_type<tc>} {
    %c0 = arith.constant 0 : index
    %c0_0 = arith.constant 0 : index
    %0 = vector.load %arg1[%c0, %c0_0] : memref<75x128xbf16, #tpu.memory_space<vmem>>, vector<75x128xbf16>
    %c0_1 = arith.constant 0 : index
    %c0_2 = arith.constant 0 : index
    %c0_3 = arith.constant 0 : index
    %1 = vector.load %arg0[%c0_1, %c0_2, %c0_3] : memref<4x392x75xbf16, #tpu.memory_space<vmem>>, vector<1x392x75xbf16>
    %2 = vector.shape_cast %1 : vector<1x392x75xbf16> to vector<392x75xbf16>
    %cst = arith.constant dense<0.000000e+00> : vector<392x128xf32>
    %3 = tpu.matmul %2, %0, %cst {dimension_numbers = #tpu.dot_dimension_numbers<[1], [0], [0], [1], [0, 0, 1, 1], [], []>} : vector<392x75xbf16>, vector<75x128xbf16>, vector<392x128xf32> -> vector<392x128xf32>
    %c1 = arith.constant 1 : index
    %c0_4 = arith.constant 0 : index
    %c0_5 = arith.constant 0 : index
    %4 = vector.load %arg0[%c1, %c0_4, %c0_5] : memref<4x392x75xbf16, #tpu.memory_space<vmem>>, vector<1x392x75xbf16>
    %5 = vector.shape_cast %4 : vector<1x392x75xbf16> to vector<392x75xbf16>
    %cst_6 = arith.constant dense<0.000000e+00> : vector<392x128xf32>
    %6 = tpu.matmul %5, %0, %cst_6 {dimension_numbers = #tpu.dot_dimension_numbers<[1], [0], [0], [1], [0, 0, 1, 1], [], []>} : vector<392x75xbf16>, vector<75x128xbf16>, vector<392x128xf32> -> vector<392x128xf32>
    %7 = arith.maximumf %3, %6 : vector<392x128xf32>
    %c2 = arith.constant 2 : index
    %c0_7 = arith.constant 0 : index
    %c0_8 = arith.constant 0 : index
    %8 = vector.load %arg0[%c2, %c0_7, %c0_8] : memref<4x392x75xbf16, #tpu.memory_space<vmem>>, vector<1x392x75xbf16>
    %9 = vector.shape_cast %8 : vector<1x392x75xbf16> to vector<392x75xbf16>
    %cst_9 = arith.constant dense<0.000000e+00> : vector<392x128xf32>
    %10 = tpu.matmul %9, %0, %cst_9 {dimension_numbers = #tpu.dot_dimension_numbers<[1], [0], [0], [1], [0, 0, 1, 1], [], []>} : vector<392x75xbf16>, vector<75x128xbf16>, vector<392x128xf32> -> vector<392x128xf32>
    %11 = arith.maximumf %7, %10 : vector<392x128xf32>
    %c3 = arith.constant 3 : index
    %c0_10 = arith.constant 0 : index
    %c0_11 = arith.constant 0 : index
    %12 = vector.load %arg0[%c3, %c0_10, %c0_11] : memref<4x392x75xbf16, #tpu.memory_space<vmem>>, vector<1x392x75xbf16>
    %13 = vector.shape_cast %12 : vector<1x392x75xbf16> to vector<392x75xbf16>
    %cst_12 = arith.constant dense<0.000000e+00> : vector<392x128xf32>
    %14 = tpu.matmul %13, %0, %cst_12 {dimension_numbers = #tpu.dot_dimension_numbers<[1], [0], [0], [1], [0, 0, 1, 1], [], []>} : vector<392x75xbf16>, vector<75x128xbf16>, vector<392x128xf32> -> vector<392x128xf32>
    %15 = arith.maximumf %11, %14 : vector<392x128xf32>
    %c0_13 = arith.constant 0 : index
    %c0_14 = arith.constant 0 : index
    %16 = vector.load %arg2[%c0_13, %c0_14] : memref<1x128xf32, #tpu.memory_space<vmem>>, vector<1x128xf32>
    %17 = vector.broadcast %16 : vector<1x128xf32> to vector<392x128xf32>
    %18 = arith.addf %15, %17 : vector<392x128xf32>
    %cst_15 = arith.constant 0.000000e+00 : f32
    %19 = vector.broadcast %cst_15 : f32 to vector<392x128xf32>
    %20 = arith.maximumf %18, %19 : vector<392x128xf32>
    %21 = arith.truncf %20 : vector<392x128xf32> to vector<392x128xbf16>
    %c0_16 = arith.constant 0 : index
    %c0_17 = arith.constant 0 : index
    %22 = vector.load %arg3[%c0_16, %c0_17] : memref<392x128xbf16, #tpu.memory_space<vmem>>, vector<392x128xbf16>
    tpu.vector_store %arg3[%c0_16, %c0_17], %21 {strides = array<i32>} : memref<392x128xbf16, #tpu.memory_space<vmem>>, vector<392x128xbf16>,
    return
  }
}

module attributes {stable_mosaic.version = 11 : i64} {
  func.func @_conv_relu_pool_kernel(%arg0: memref<4x50x150xbf16, #tpu.memory_space<vmem>>, %arg1: memref<150x128xbf16, #tpu.memory_space<vmem>>, %arg2: memref<1x128xf32, #tpu.memory_space<vmem>>, %arg3: memref<50x128xbf16, #tpu.memory_space<vmem>>) attributes {dimension_semantics = [], scalar_prefetch = 0 : i64, scratch_operands = 0 : i64, tpu.core_type = #tpu.core_type<tc>} {
    %c0 = arith.constant 0 : index
    %c0_0 = arith.constant 0 : index
    %0 = vector.load %arg1[%c0, %c0_0] : memref<150x128xbf16, #tpu.memory_space<vmem>>, vector<150x128xbf16>
    %c0_1 = arith.constant 0 : index
    %c0_2 = arith.constant 0 : index
    %c0_3 = arith.constant 0 : index
    %1 = vector.load %arg0[%c0_1, %c0_2, %c0_3] : memref<4x50x150xbf16, #tpu.memory_space<vmem>>, vector<1x50x150xbf16>
    %2 = vector.shape_cast %1 : vector<1x50x150xbf16> to vector<50x150xbf16>
    %cst = arith.constant dense<0.000000e+00> : vector<50x128xf32>
    %3 = tpu.matmul %2, %0, %cst {dimension_numbers = #tpu.dot_dimension_numbers<[1], [0], [0], [1], [0, 0, 1, 1], [], []>} : vector<50x150xbf16>, vector<150x128xbf16>, vector<50x128xf32> -> vector<50x128xf32>
    %c1 = arith.constant 1 : index
    %c0_4 = arith.constant 0 : index
    %c0_5 = arith.constant 0 : index
    %4 = vector.load %arg0[%c1, %c0_4, %c0_5] : memref<4x50x150xbf16, #tpu.memory_space<vmem>>, vector<1x50x150xbf16>
    %5 = vector.shape_cast %4 : vector<1x50x150xbf16> to vector<50x150xbf16>
    %cst_6 = arith.constant dense<0.000000e+00> : vector<50x128xf32>
    %6 = tpu.matmul %5, %0, %cst_6 {dimension_numbers = #tpu.dot_dimension_numbers<[1], [0], [0], [1], [0, 0, 1, 1], [], []>} : vector<50x150xbf16>, vector<150x128xbf16>, vector<50x128xf32> -> vector<50x128xf32>
    %7 = arith.maximumf %3, %6 : vector<50x128xf32>
    %c2 = arith.constant 2 : index
    %c0_7 = arith.constant 0 : index
    %c0_8 = arith.constant 0 : index
    %8 = vector.load %arg0[%c2, %c0_7, %c0_8] : memref<4x50x150xbf16, #tpu.memory_space<vmem>>, vector<1x50x150xbf16>
    %9 = vector.shape_cast %8 : vector<1x50x150xbf16> to vector<50x150xbf16>
    %cst_9 = arith.constant dense<0.000000e+00> : vector<50x128xf32>
    %10 = tpu.matmul %9, %0, %cst_9 {dimension_numbers = #tpu.dot_dimension_numbers<[1], [0], [0], [1], [0, 0, 1, 1], [], []>} : vector<50x150xbf16>, vector<150x128xbf16>, vector<50x128xf32> -> vector<50x128xf32>
    %11 = arith.maximumf %7, %10 : vector<50x128xf32>
    %c3 = arith.constant 3 : index
    %c0_10 = arith.constant 0 : index
    %c0_11 = arith.constant 0 : index
    %12 = vector.load %arg0[%c3, %c0_10, %c0_11] : memref<4x50x150xbf16, #tpu.memory_space<vmem>>, vector<1x50x150xbf16>
    %13 = vector.shape_cast %12 : vector<1x50x150xbf16> to vector<50x150xbf16>
    %cst_12 = arith.constant dense<0.000000e+00> : vector<50x128xf32>
    %14 = tpu.matmul %13, %0, %cst_12 {dimension_numbers = #tpu.dot_dimension_numbers<[1], [0], [0], [1], [0, 0, 1, 1], [], []>} : vector<50x150xbf16>, vector<150x128xbf16>, vector<50x128xf32> -> vector<50x128xf32>
    %15 = arith.maximumf %11, %14 : vector<50x128xf32>
    %c0_13 = arith.constant 0 : index
    %c0_14 = arith.constant 0 : index
    %16 = vector.load %arg2[%c0_13, %c0_14] : memref<1x128xf32, #tpu.memory_space<vmem>>, vector<1x128xf32>
    %17 = vector.broadcast %16 : vector<1x128xf32> to vector<50x128xf32>
    %18 = arith.addf %15, %17 : vector<50x128xf32>
    %cst_15 = arith.constant 0.000000e+00 : f32
    %19 = vector.broadcast %cst_15 : f32 to vector<50x128xf32>
    %20 = arith.maximumf %18, %19 : vector<50x128xf32>
    %21 = arith.truncf %20 : vector<50x128xf32> to vector<50x128xbf16>
    %c0_16 = arith.constant 0 : index
    %c0_17 = arith.constant 0 : index
    %22 = vector.load %arg3[%c0_16, %c0_17] : memref<50x128xbf16, #tpu.memory_space<vmem>>, vector<50x128xbf16>
    tpu.vector_store %arg3[%c0_16, %c0_17], %21 {strides = array<i32>} : memref<50x128xbf16, #tpu.memory_space<vmem>>, vector<50x128xbf16>,
    return
  }
}

module attributes {stable_mosaic.version = 11 : i64} {
  func.func @_fc_chain_kernel(%arg0: memref<2x400xbf16, #tpu.memory_space<vmem>>, %arg1: memref<400x128xbf16, #tpu.memory_space<vmem>>, %arg2: memref<1x128xf32, #tpu.memory_space<vmem>>, %arg3: memref<128x128xbf16, #tpu.memory_space<vmem>>, %arg4: memref<1x128xf32, #tpu.memory_space<vmem>>, %arg5: memref<128x10xbf16, #tpu.memory_space<vmem>>, %arg6: memref<1x10xf32, #tpu.memory_space<vmem>>, %arg7: memref<2x10xf32, #tpu.memory_space<vmem>>) attributes {dimension_semantics = [], scalar_prefetch = 0 : i64, scratch_operands = 0 : i64, tpu.core_type = #tpu.core_type<tc>} {
    %c0 = arith.constant 0 : index
    %c0_0 = arith.constant 0 : index
    %0 = vector.load %arg0[%c0, %c0_0] : memref<2x400xbf16, #tpu.memory_space<vmem>>, vector<2x400xbf16>
    %c0_1 = arith.constant 0 : index
    %c0_2 = arith.constant 0 : index
    %1 = vector.load %arg1[%c0_1, %c0_2] : memref<400x128xbf16, #tpu.memory_space<vmem>>, vector<400x128xbf16>
    %cst = arith.constant dense<0.000000e+00> : vector<2x128xf32>
    %2 = tpu.matmul %0, %1, %cst {dimension_numbers = #tpu.dot_dimension_numbers<[1], [0], [0], [1], [0, 0, 1, 1], [], []>} : vector<2x400xbf16>, vector<400x128xbf16>, vector<2x128xf32> -> vector<2x128xf32>
    %c0_3 = arith.constant 0 : index
    %c0_4 = arith.constant 0 : index
    %3 = vector.load %arg2[%c0_3, %c0_4] : memref<1x128xf32, #tpu.memory_space<vmem>>, vector<1x128xf32>
    %4 = vector.broadcast %3 : vector<1x128xf32> to vector<2x128xf32>
    %5 = arith.addf %2, %4 : vector<2x128xf32>
    %cst_5 = arith.constant 0.000000e+00 : f32
    %6 = vector.broadcast %cst_5 : f32 to vector<2x128xf32>
    %7 = arith.maximumf %5, %6 : vector<2x128xf32>
    %8 = arith.truncf %7 : vector<2x128xf32> to vector<2x128xbf16>
    %c0_6 = arith.constant 0 : index
    %c0_7 = arith.constant 0 : index
    %9 = vector.load %arg3[%c0_6, %c0_7] : memref<128x128xbf16, #tpu.memory_space<vmem>>, vector<128x128xbf16>
    %cst_8 = arith.constant dense<0.000000e+00> : vector<2x128xf32>
    %10 = tpu.matmul %8, %9, %cst_8 {dimension_numbers = #tpu.dot_dimension_numbers<[1], [0], [0], [1], [0, 0, 1, 1], [], []>} : vector<2x128xbf16>, vector<128x128xbf16>, vector<2x128xf32> -> vector<2x128xf32>
    %c0_9 = arith.constant 0 : index
    %c0_10 = arith.constant 0 : index
    %11 = vector.load %arg4[%c0_9, %c0_10] : memref<1x128xf32, #tpu.memory_space<vmem>>, vector<1x128xf32>
    %12 = vector.broadcast %11 : vector<1x128xf32> to vector<2x128xf32>
    %13 = arith.addf %10, %12 : vector<2x128xf32>
    %cst_11 = arith.constant 0.000000e+00 : f32
    %14 = vector.broadcast %cst_11 : f32 to vector<2x128xf32>
    %15 = arith.maximumf %13, %14 : vector<2x128xf32>
    %16 = arith.truncf %15 : vector<2x128xf32> to vector<2x128xbf16>
    %c0_12 = arith.constant 0 : index
    %c0_13 = arith.constant 0 : index
    %17 = vector.load %arg5[%c0_12, %c0_13] : memref<128x10xbf16, #tpu.memory_space<vmem>>, vector<128x10xbf16>
    %cst_14 = arith.constant dense<0.000000e+00> : vector<2x10xf32>
    %18 = tpu.matmul %16, %17, %cst_14 {dimension_numbers = #tpu.dot_dimension_numbers<[1], [0], [0], [1], [0, 0, 1, 1], [], []>} : vector<2x128xbf16>, vector<128x10xbf16>, vector<2x10xf32> -> vector<2x10xf32>
    %c0_15 = arith.constant 0 : index
    %c0_16 = arith.constant 0 : index
    %19 = vector.load %arg6[%c0_15, %c0_16] : memref<1x10xf32, #tpu.memory_space<vmem>>, vector<1x10xf32>
    %20 = vector.broadcast %19 : vector<1x10xf32> to vector<2x10xf32>
    %21 = arith.addf %18, %20 : vector<2x10xf32>
    %c0_17 = arith.constant 0 : index
    %c0_18 = arith.constant 0 : index
    %22 = vector.load %arg7[%c0_17, %c0_18] : memref<2x10xf32, #tpu.memory_space<vmem>>, vector<2x10xf32>
    tpu.vector_store %arg7[%c0_17, %c0_18], %21 {strides = array<i32>} : memref<2x10xf32, #tpu.memory_space<vmem>>, vector<2x10xf32>,
    return
  }
}

</mosaic_0001>

<bundles_post_ra>
// kernel: lenet_forward.3
= control target key start
LH: loop header
LB: loop body
LE: loop exit
PB: predicated region body
PF: predicated region fallthrough
CT: control target
= control target key end

     0   :  { %v4977_v0 = vmov 0.0   ;;  %vm3746_vm0 = vmmov 0   ;;  %vm302_vm1 = vcmask 1044480   ;;  %vm303_vm2 = vcmask 1045504   ;;  %s4973_s1 = inlined_call_operand.vmem [shape: bf16[75,128], index: 1, kind: input, shape index: {}]   ;;  %s4974_s0 = inlined_call_operand.vmem [shape: bf16[4,392,75], index: 0, kind: input, shape index: {}]   ;;  %s4975_s2 = inlined_call_operand.vmem [shape: f32[1,128], index: 2, kind: input, shape index: {}]   ;;  %s4976_s3 = inlined_call_operand.vmem [shape: bf16[392,128], index: 3, kind: output, shape index: {}]  }
   0x1   :  { %3197 = vmatprep.subr.bf16.mxu0 %v4977_v0  ;;  %3307 = vmatprep.subr.bf16.mxu1 %v4977_v0  ;;  %v3640_v1 = vld [vmem:[%s4973_s1] sm:$0xff]   ;;  %v3641_v2 = vld [vmem:[%s4973_s1 + $0x8] sm:$0xff]   ;;  %v3642_v3 = vld [vmem:[%s4973_s1 + $0x10] sm:$0xff]   ;;  %v3747_v4 = vmov 65535   ;;  %vm226_vm3 = vcmask 613376  }
   0x2   :  { %3198 = vmatpush3.bf16.msra.mxu0 %v3640_v1  ;;  %3308 = vmatpush3.bf16.msra.mxu1 %v3640_v1  ;;  %v304_v5 = vsel %vm302_vm1, 4294967295, %v3747_v4  ;;  %v3643_v6 = vld [vmem:[%s4973_s1 + $0x18] sm:$0xff]   ;;  %v3644_v7 = vld [vmem:[%s4973_s1 + $0x20] sm:$0x3f]   ;;  %v3647_v12 = vld [vmem:[%s4974_s0 + $0x8] sm:$0xff]  }
   0x3   :  { %3199 = vmatprep.subr.bf16.mxu0 %v4977_v0  ;;  %3309 = vmatprep.subr.bf16.mxu1 %v4977_v0  ;;  %v305_v8 = vsel %vm303_vm2, %v304_v5, 0  ;;  %v3645_v10 = vld [vmem:[%s4974_s0] sm:$0xff]   ;;  %v3648_v13 = vld [vmem:[%s4974_s0 + $0xcc] sm:$0xff]   ;;  %v3650_v15 = vld [vmem:[%s4974_s0 + $0xd4] sm:$0xff]  }
   0x4   :  { %3207 = vmatprep.mubr.msk.bf16.mxu0 %vm3746_vm0, %v4977_v0  ;;  %3317 = vmatprep.mubr.msk.bf16.mxu1 %vm3746_vm0, %v4977_v0  ;;  %v307_v9 = vand.u32 %v3644_v7, %v305_v8  ;;  %v3646_v11 = vld [vmem:[%s4974_s0 + $0xc4] sm:$0xff]   ;;  %v3649_v14 = vld [vmem:[%s4974_s0 + $0x10] sm:$0xff]   ;;  %v3651_v16 = vld [vmem:[%s4974_s0 + $0x18] sm:$0xff]  }
   0x5   :  { %v3652_v17 = vld [vmem:[%s4974_s0 + $0xdc] sm:$0xff]   ;;  %v3654_v19 = vld [vmem:[%s4974_s0 + $0xe4] sm:$0xff]   ;;  %v3656_v21 = vld [vmem:[%s4974_s0 + $0xec] sm:$0xff]  }
   0x6   :  { %3200 = vmatpush3.bf16.msra.mxu0 %v3641_v2  ;;  %3310 = vmatpush3.bf16.msra.mxu1 %v3641_v2  ;;  %v3653_v18 = vld [vmem:[%s4974_s0 + $0x20] sm:$0xff]   ;;  %v3655_v20 = vld [vmem:[%s4974_s0 + $0x28] sm:$0xff]   ;;  %v3657_v22 = vld [vmem:[%s4974_s0 + $0x30] sm:$0xff]  }
   0x7   :  { %3201 = vmatprep.subr.bf16.mxu0 %v4977_v0  ;;  %3311 = vmatprep.subr.bf16.mxu1 %v4977_v0  ;;  %v3658_v23 = vld [vmem:[%s4974_s0 + $0xf4] sm:$0xff]   ;;  %v3660_v25 = vld [vmem:[%s4974_s0 + $0xfc] sm:$0xff]   ;;  %v3662_v27 = vld [vmem:[%s4974_s0 + $0x104] sm:$0xff]  }
   0x8   :  { %v3659_v24 = vld [vmem:[%s4974_s0 + $0x38] sm:$0xff]   ;;  %v3661_v26 = vld [vmem:[%s4974_s0 + $0x40] sm:$0xff]   ;;  %v3663_v28 = vld [vmem:[%s4974_s0 + $0x48] sm:$0xff]  }
   0x9   :  { %v3664_v29 = vld [vmem:[%s4974_s0 + $0x10c] sm:$0xff]   ;;  %v3666_v31 = vld [vmem:[%s4974_s0 + $0x114] sm:$0xff]   ;;  %v3668_v33 = vld [vmem:[%s4974_s0 + $0x11c] sm:$0xff]  }
   0xa   :  { %3202 = vmatpush3.bf16.msra.mxu0 %v3642_v3  ;;  %3312 = vmatpush3.bf16.msra.mxu1 %v3642_v3  ;;  %v3665_v30 = vld [vmem:[%s4974_s0 + $0x50] sm:$0xff]   ;;  %v3667_v32 = vld [vmem:[%s4974_s0 + $0x58] sm:$0xff]   ;;  %v3669_v34 = vld [vmem:[%s4974_s0 + $0x60] sm:$0xff]  }
   0xb   :  { %3203 = vmatprep.subr.bf16.mxu0 %v4977_v0  ;;  %3313 = vmatprep.subr.bf16.mxu1 %v4977_v0  ;;  %v3670_v35 = vld [vmem:[%s4974_s0 + $0x124] sm:$0xff]   ;;  %v3672_v37 = vld [vmem:[%s4974_s0 + $0x12c] sm:$0xff]   ;;  %v3674_v39 = vld [vmem:[%s4974_s0 + $0x134] sm:$0xff]  }
   0xc   :  { %v3671_v36 = vld [vmem:[%s4974_s0 + $0x68] sm:$0xff]   ;;  %v3673_v38 = vld [vmem:[%s4974_s0 + $0x70] sm:$0xff]   ;;  %v3675_v40 = vld [vmem:[%s4974_s0 + $0x78] sm:$0xff]  }
   0xd   :  { %v3676_v41 = vld [vmem:[%s4974_s0 + $0x13c] sm:$0xff]   ;;  %v3678_v43 = vld [vmem:[%s4974_s0 + $0x144] sm:$0xff]   ;;  %v3680_v45 = vld [vmem:[%s4974_s0 + $0x14c] sm:$0xff]  }
   0xe   :  { %3204 = vmatpush3.bf16.msra.mxu0 %v3643_v6  ;;  %3314 = vmatpush3.bf16.msra.mxu1 %v3643_v6  ;;  %v3677_v42 = vld [vmem:[%s4974_s0 + $0x80] sm:$0xff]   ;;  %v3679_v44 = vld [vmem:[%s4974_s0 + $0x88] sm:$0xff]   ;;  %v3681_v46 = vld [vmem:[%s4974_s0 + $0x90] sm:$0xff]  }
   0xf   :  { %3205 = vmatprep.subr.bf16.mxu0 %v4977_v0  ;;  %3315 = vmatprep.subr.bf16.mxu1 %v4977_v0  ;;  %v3682_v47 = vld [vmem:[%s4974_s0 + $0x154] sm:$0xff]   ;;  %v3684_v49 = vld [vmem:[%s4974_s0 + $0x15c] sm:$0xff]   ;;  %v3686_v51 = vld [vmem:[%s4974_s0 + $0x164] sm:$0xff]  }
  0x10   :  { %v3683_v48 = vld [vmem:[%s4974_s0 + $0x98] sm:$0xff]   ;;  %v3685_v50 = vld [vmem:[%s4974_s0 + $0xa0] sm:$0xff]   ;;  %v3687_v52 = vld [vmem:[%s4974_s0 + $0xa8] sm:$0xff]  }
  0x11   :  { %v3688_v53 = vld [vmem:[%s4974_s0 + $0x16c] sm:$0xff]   ;;  %v3690_v55 = vld [vmem:[%s4974_s0 + $0x174] sm:$0xff]   ;;  %v3692_v57 = vld [vmem:[%s4974_s0 + $0x17c] sm:$0xff]  }
  0x12   :  { %3206 = vmatpush3.bf16.msra.mxu0 %v307_v9  ;;  %3316 = vmatpush3.bf16.msra.mxu1 %v307_v9  ;;  %v3689_v54 = vld [vmem:[%s4974_s0 + $0xb0] sm:$0xff]   ;;  %v3691_v56 = vld [vmem:[%s4974_s0 + $0xb8] sm:$0xff]   ;;  %v3693_v58 = vld [vmem:[%s4974_s0 + $0xc0] ss:$0 sps:$4 sm:$0xff]  }
  0x13   :  { %3417 = vmatprep.subr.bf16.mxu0 %v4977_v0  ;;  %3527 = vmatprep.subr.bf16.mxu1 %v4977_v0  ;;  %v3694_v59 = vld [vmem:[%s4974_s0 + $0x184] ss:$0 sps:$4 sm:$0xff]   ;;  %v3695_v60 = vld [vmem:[%s4974_s0 + $0x188] sm:$0xff]   ;;  %v3697_v62 = vld [vmem:[%s4974_s0 + $0x190] sm:$0xff]  }
  0x14   :  { %v3696_v61 = vld [vmem:[%s4974_s0 + $0x24c] sm:$0xff]   ;;  %v3698_v63 = vld [vmem:[%s4974_s0 + $0x254] sm:$0xff]   ;;  %v3700_v7 = vld [vmem:[%s4974_s0 + $0x25c] sm:$0xff]  }
  0x15   :  { %3208 = vmatmul.mubr.msk.bf16.vlgmr.msra.gmra.mrb[0].mxu0 %vm226_vm3, %v3645_v10  ;;  %3318 = vmatmul.mubr.msk.bf16.vlgmr.msra.gmra.mrb[0].mxu1 %vm226_vm3, %v3646_v11 }
  0x16   :  { %3418 = vmatpush3.bf16.msra.mxu0 %v3640_v1  ;;  %3528 = vmatpush3.bf16.msra.mxu1 %v3640_v1 }
  0x17   :  { %3211 = vmatprep.mubr.msk.bf16.mxu0 %vm3746_vm0, %v4977_v0  ;;  %3321 = vmatprep.mubr.msk.bf16.mxu1 %vm3746_vm0, %v4977_v0 }
  0x18   :  { %3419 = vmatprep.subr.bf16.mxu0 %v4977_v0  ;;  %3529 = vmatprep.subr.bf16.mxu1 %v4977_v0 }
  0x1a   :  { %3420 = vmatpush3.bf16.msra.mxu0 %v3641_v2  ;;  %3530 = vmatpush3.bf16.msra.mxu1 %v3641_v2 }
  0x1b   :  { %3421 = vmatprep.subr.bf16.mxu0 %v4977_v0  ;;  %3531 = vmatprep.subr.bf16.mxu1 %v4977_v0 }
  0x1d   :  { %3212 = vmatmul.mubr.msk.bf16.gmra.mrb[4].mxu0 %vm226_vm3, %v3647_v12  ;;  %3322 = vmatmul.mubr.msk.bf16.gmra.mrb[4].mxu1 %vm226_vm3, %v3648_v13 }
  0x1e   :  { %3215 = vmatprep.mubr.msk.bf16.mxu0 %vm3746_vm0, %v4977_v0  ;;  %3325 = vmatprep.mubr.msk.bf16.mxu1 %vm3746_vm0, %v4977_v0 }
  0x1f   :  { %3422 = vmatpush3.bf16.msra.mxu0 %v3642_v3  ;;  %3532 = vmatpush3.bf16.msra.mxu1 %v3642_v3 }
  0x20   :  { %3423 = vmatprep.subr.bf16.mxu0 %v4977_v0  ;;  %3533 = vmatprep.subr.bf16.mxu1 %v4977_v0 }
  0x23   :  { %3424 = vmatpush3.bf16.msra.mxu0 %v3643_v6  ;;  %3534 = vmatpush3.bf16.msra.mxu1 %v3643_v6  ;;  %v3699_v6 = vld [vmem:[%s4974_s0 + $0x198] sm:$0xff]  }
  0x24   :  { %3425 = vmatprep.subr.bf16.mxu0 %v4977_v0  ;;  %3535 = vmatprep.subr.bf16.mxu1 %v4977_v0 }
  0x25   :  { %3216 = vmatmul.mubr.msk.bf16.gmra.mrb[8].mxu0 %vm226_vm3, %v3649_v14  ;;  %3326 = vmatmul.mubr.msk.bf16.gmra.mrb[8].mxu1 %vm226_vm3, %v3650_v15 }
  0x26   :  { %3219 = vmatprep.mubr.msk.bf16.mxu0 %vm3746_vm0, %v4977_v0  ;;  %3329 = vmatprep.mubr.msk.bf16.mxu1 %vm3746_vm0, %v4977_v0 }
  0x27   :  { %3426 = vmatpush3.bf16.msra.mxu0 %v307_v9  ;;  %3536 = vmatpush3.bf16.msra.mxu1 %v307_v9 }
  0x2d   :  { %3220 = vmatmul.mubr.msk.bf16.gmra.mrb[12].mxu0 %vm226_vm3, %v3651_v16  ;;  %3330 = vmatmul.mubr.msk.bf16.gmra.mrb[12].mxu1 %vm226_vm3, %v3652_v17 }
  0x2e   :  { %3223 = vmatprep.mubr.msk.bf16.mxu0 %vm3746_vm0, %v4977_v0  ;;  %3333 = vmatprep.mubr.msk.bf16.mxu1 %vm3746_vm0, %v4977_v0 }
  0x35   :  { %3224 = vmatmul.mubr.msk.bf16.gmra.mrb[16].mxu0 %vm226_vm3, %v3653_v18  ;;  %3334 = vmatmul.mubr.msk.bf16.gmra.mrb[16].mxu1 %vm226_vm3, %v3654_v19  ;;  %v3701_v18 = vld [vmem:[%s4974_s0 + $0x1a0] sm:$0xff]  }
  0x36   :  { %3227 = vmatprep.mubr.msk.bf16.mxu0 %vm3746_vm0, %v4977_v0  ;;  %3337 = vmatprep.mubr.msk.bf16.mxu1 %vm3746_vm0, %v4977_v0  ;;  %v3702_v19 = vld [vmem:[%s4974_s0 + $0x264] sm:$0xff]  }
  0x3d   :  { %3228 = vmatmul.mubr.msk.bf16.gmra.mrb[20].mxu0 %vm226_vm3, %v3655_v20  ;;  %3338 = vmatmul.mubr.msk.bf16.gmra.mrb[20].mxu1 %vm226_vm3, %v3656_v21 }
  0x3e   :  { %3231 = vmatprep.mubr.msk.bf16.mxu0 %vm3746_vm0, %v4977_v0  ;;  %3341 = vmatprep.mubr.msk.bf16.mxu1 %vm3746_vm0, %v4977_v0 }
  0x45   :  { %3232 = vmatmul.mubr.msk.bf16.gmra.mrb[24].mxu0 %vm226_vm3, %v3657_v22  ;;  %3342 = vmatmul.mubr.msk.bf16.gmra.mrb[24].mxu1 %vm226_vm3, %v3658_v23 }
  0x46   :  { %3235 = vmatprep.mubr.msk.bf16.mxu0 %vm3746_vm0, %v4977_v0  ;;  %3345 = vmatprep.mubr.msk.bf16.mxu1 %vm3746_vm0, %v4977_v0 }
  0x4d   :  { %3236 = vmatmul.mubr.msk.bf16.gmra.mrb[28].mxu0 %vm226_vm3, %v3659_v24  ;;  %3346 = vmatmul.mubr.msk.bf16.gmra.mrb[28].mxu1 %vm226_vm3, %v3660_v25 }
  0x4e   :  { %3239 = vmatprep.mubr.msk.bf16.mxu0 %vm3746_vm0, %v4977_v0  ;;  %3349 = vmatprep.mubr.msk.bf16.mxu1 %vm3746_vm0, %v4977_v0 }
  0x55   :  { %3240 = vmatmul.mubr.msk.bf16.gmra.mrb[32].mxu0 %vm226_vm3, %v3661_v26  ;;  %3350 = vmatmul.mubr.msk.bf16.gmra.mrb[32].mxu1 %vm226_vm3, %v3662_v27 }
  0x56   :  { %3243 = vmatprep.mubr.msk.bf16.mxu0 %vm3746_vm0, %v4977_v0  ;;  %3353 = vmatprep.mubr.msk.bf16.mxu1 %vm3746_vm0, %v4977_v0 }
  0x5d   :  { %3244 = vmatmul.mubr.msk.bf16.gmra.mrb[36].mxu0 %vm226_vm3, %v3663_v28  ;;  %3354 = vmatmul.mubr.msk.bf16.gmra.mrb[36].mxu1 %vm226_vm3, %v3664_v29 }
  0x5e   :  { %3247 = vmatprep.mubr.msk.bf16.mxu0 %vm3746_vm0, %v4977_v0  ;;  %3357 = vmatprep.mubr.msk.bf16.mxu1 %vm3746_vm0, %v4977_v0 }
  0x65   :  { %3248 = vmatmul.mubr.msk.bf16.gmra.mrb[40].mxu0 %vm226_vm3, %v3665_v30  ;;  %3358 = vmatmul.mubr.msk.bf16.gmra.mrb[40].mxu1 %vm226_vm3, %v3666_v31  ;;  %v3703_v30 = vld [vmem:[%s4974_s0 + $0x1a8] sm:$0xff]  }
  0x66   :  { %3251 = vmatprep.mubr.msk.bf16.mxu0 %vm3746_vm0, %v4977_v0  ;;  %3361 = vmatprep.mubr.msk.bf16.mxu1 %vm3746_vm0, %v4977_v0  ;;  %v3704_v31 = vld [vmem:[%s4974_s0 + $0x26c] sm:$0xff]  }
  0x6d   :  { %3252 = vmatmul.mubr.msk.bf16.gmra.mrb[44].mxu0 %vm226_vm3, %v3667_v32  ;;  %3362 = vmatmul.mubr.msk.bf16.gmra.mrb[44].mxu1 %vm226_vm3, %v3668_v33 }
  0x6e   :  { %3255 = vmatprep.mubr.msk.bf16.mxu0 %vm3746_vm0, %v4977_v0  ;;  %3365 = vmatprep.mubr.msk.bf16.mxu1 %vm3746_vm0, %v4977_v0 }
  0x75   :  { %3256 = vmatmul.mubr.msk.bf16.gmra.mrb[48].mxu0 %vm226_vm3, %v3669_v34  ;;  %3366 = vmatmul.mubr.msk.bf16.gmra.mrb[48].mxu1 %vm226_vm3, %v3670_v35 }
  0x76   :  { %3259 = vmatprep.mubr.msk.bf16.mxu0 %vm3746_vm0, %v4977_v0  ;;  %3369 = vmatprep.mubr.msk.bf16.mxu1 %vm3746_vm0, %v4977_v0 }
  0x7d   :  { %3260 = vmatmul.mubr.msk.bf16.gmra.mrb[52].mxu0 %vm226_vm3, %v3671_v36  ;;  %3370 = vmatmul.mubr.msk.bf16.gmra.mrb[52].mxu1 %vm226_vm3, %v3672_v37 }
  0x7e   :  { %3263 = vmatprep.mubr.msk.bf16.mxu0 %vm3746_vm0, %v4977_v0  ;;  %3373 = vmatprep.mubr.msk.bf16.mxu1 %vm3746_vm0, %v4977_v0 }
  0x85   :  { %3264 = vmatmul.mubr.msk.bf16.gmra.mrb[56].mxu0 %vm226_vm3, %v3673_v38  ;;  %3374 = vmatmul.mubr.msk.bf16.gmra.mrb[56].mxu1 %vm226_vm3, %v3674_v39 }
  0x86   :  { %3267 = vmatprep.mubr.msk.bf16.mxu0 %vm3746_vm0, %v4977_v0  ;;  %3377 = vmatprep.mubr.msk.bf16.mxu1 %vm3746_vm0, %v4977_v0 }
  0x8d   :  { %3268 = vmatmul.mubr.msk.bf16.gmra.mrb[60].mxu0 %vm226_vm3, %v3675_v40  ;;  %3378 = vmatmul.mubr.msk.bf16.gmra.mrb[60].mxu1 %vm226_vm3, %v3676_v41 }
  0x8e   :  { %3271 = vmatprep.mubr.msk.bf16.mxu0 %vm3746_vm0, %v4977_v0  ;;  %3381 = vmatprep.mubr.msk.bf16.mxu1 %vm3746_vm0, %v4977_v0 }
  0x95   :  { %3272 = vmatmul.mubr.msk.bf16.gmra.mrb[64].mxu0 %vm226_vm3, %v3677_v42  ;;  %3382 = vmatmul.mubr.msk.bf16.gmra.mrb[64].mxu1 %vm226_vm3, %v3678_v43  ;;  %v3705_v42 = vld [vmem:[%s4974_s0 + $0x1b0] sm:$0xff]  }
  0x96   :  { %3275 = vmatprep.mubr.msk.bf16.mxu0 %vm3746_vm0, %v4977_v0  ;;  %3385 = vmatprep.mubr.msk.bf16.mxu1 %vm3746_vm0, %v4977_v0  ;;  %v3706_v43 = vld [vmem:[%s4974_s0 + $0x274] sm:$0xff]  }
  0x9d   :  { %3276 = vmatmul.mubr.msk.bf16.gmra.mrb[68].mxu0 %vm226_vm3, %v3679_v44  ;;  %3386 = vmatmul.mubr.msk.bf16.gmra.mrb[68].mxu1 %vm226_vm3, %v3680_v45 }
  0x9e   :  { %3279 = vmatprep.mubr.msk.bf16.mxu0 %vm3746_vm0, %v4977_v0  ;;  %3389 = vmatprep.mubr.msk.bf16.mxu1 %vm3746_vm0, %v4977_v0 }
  0xa5   :  { %3280 = vmatmul.mubr.msk.bf16.gmra.mrb[72].mxu0 %vm226_vm3, %v3681_v46  ;;  %3390 = vmatmul.mubr.msk.bf16.gmra.mrb[72].mxu1 %vm226_vm3, %v3682_v47 }
  0xa6   :  { %3283 = vmatprep.mubr.msk.bf16.mxu0 %vm3746_vm0, %v4977_v0  ;;  %3393 = vmatprep.mubr.msk.bf16.mxu1 %vm3746_vm0, %v4977_v0 }
  0xad   :  { %3284 = vmatmul.mubr.msk.bf16.gmra.mrb[76].mxu0 %vm226_vm3, %v3683_v48  ;;  %3394 = vmatmul.mubr.msk.bf16.gmra.mrb[76].mxu1 %vm226_vm3, %v3684_v49 }
  0xae   :  { %3287 = vmatprep.mubr.msk.bf16.mxu0 %vm3746_vm0, %v4977_v0  ;;  %3397 = vmatprep.mubr.msk.bf16.mxu1 %vm3746_vm0, %v4977_v0 }
  0xb5   :  { %3288 = vmatmul.mubr.msk.bf16.gmra.mrb[80].mxu0 %vm226_vm3, %v3685_v50  ;;  %3398 = vmatmul.mubr.msk.bf16.gmra.mrb[80].mxu1 %vm226_vm3, %v3686_v51 }
  0xb6   :  { %3291 = vmatprep.mubr.msk.bf16.mxu0 %vm3746_vm0, %v4977_v0  ;;  %3401 = vmatprep.mubr.msk.bf16.mxu1 %vm3746_vm0, %v4977_v0 }
  0xbd   :  { %3292 = vmatmul.mubr.msk.bf16.gmra.mrb[84].mxu0 %vm226_vm3, %v3687_v52  ;;  %3402 = vmatmul.mubr.msk.bf16.gmra.mrb[84].mxu1 %vm226_vm3, %v3688_v53 }
  0xbe   :  { %3295 = vmatprep.mubr.msk.bf16.mxu0 %vm3746_vm0, %v4977_v0  ;;  %3405 = vmatprep.mubr.msk.bf16.mxu1 %vm3746_vm0, %v4977_v0 }
  0xc5   :  { %3296 = vmatmul.mubr.msk.bf16.gmra.mrb[88].mxu0 %vm226_vm3, %v3689_v54  ;;  %3406 = vmatmul.mubr.msk.bf16.gmra.mrb[88].mxu1 %vm226_vm3, %v3690_v55  ;;  %v3707_v54 = vld [vmem:[%s4974_s0 + $0x1b8] sm:$0xff]  }
  0xc6   :  { %3299 = vmatprep.mubr.msk.bf16.mxu0 %vm3746_vm0, %v4977_v0  ;;  %3409 = vmatprep.mubr.msk.bf16.mxu1 %vm3746_vm0, %v4977_v0  ;;  %v3708_v55 = vld [vmem:[%s4974_s0 + $0x27c] sm:$0xff]  }
  0xcd   :  { %3300 = vmatmul.mubr.msk.bf16.gmra.mrb[92].mxu0 %vm226_vm3, %v3691_v56  ;;  %3410 = vmatmul.mubr.msk.bf16.gmra.mrb[92].mxu1 %vm226_vm3, %v3692_v57 }
  0xce   :  { %3303 = vmatprep.mubr.msk.bf16.mxu0 %vm3746_vm0, %v4977_v0  ;;  %3413 = vmatprep.mubr.msk.bf16.mxu1 %vm3746_vm0, %v4977_v0 }
  0xd5   :  { %3304 = vmatmul.mubr.msk.bf16.gmra.mrb[96].mxu0 %vm226_vm3, %v3693_v58  ;;  %3414 = vmatmul.mubr.msk.bf16.gmra.mrb[96].mxu1 %vm226_vm3, %v3694_v59 }
  0xd6   :  { %3427 = vmatprep.mubr.msk.bf16.mxu0 %vm3746_vm0, %v4977_v0  ;;  %3537 = vmatprep.mubr.msk.bf16.mxu1 %vm3746_vm0, %v4977_v0 }
  0xdd   :  { %3428 = vmatmul.mubr.msk.bf16.vlgmr.msra.gmra.mrb[100].mxu0 %vm226_vm3, %v3695_v60  ;;  %3538 = vmatmul.mubr.msk.bf16.vlgmr.msra.gmra.mrb[100].mxu1 %vm226_vm3, %v3696_v61 }
  0xde   :  { %3431 = vmatprep.mubr.msk.bf16.mxu0 %vm3746_vm0, %v4977_v0  ;;  %3541 = vmatprep.mubr.msk.bf16.mxu1 %vm3746_vm0, %v4977_v0 }
  0xe5   :  { %3432 = vmatmul.mubr.msk.bf16.gmra.mrb[104].mxu0 %vm226_vm3, %v3697_v62  ;;  %3542 = vmatmul.mubr.msk.bf16.gmra.mrb[104].mxu1 %vm226_vm3, %v3698_v63 }
  0xe6   :  { %3435 = vmatprep.mubr.msk.bf16.mxu0 %vm3746_vm0, %v4977_v0  ;;  %3545 = vmatprep.mubr.msk.bf16.mxu1 %vm3746_vm0, %v4977_v0 }
  0xe8   :  { %v4131_v1 = vpop.f32.mrb[0].mxu0  ;;  %v4133_v2 = vpop.f32.mrb[0].mxu1 }
  0xe9   :  { %v3209_v4 = vpop.f32.mrb[1].mxu0  ;;  %v3319_v5 = vpop.f32.mrb[1].mxu1 }
  0xea   :  { %v4143_v8 = vpop.f32.mrb[2].mxu0  ;;  %v4145_v9 = vpop.f32.mrb[2].mxu1 }
  0xeb   :  { %v3210_v11 = vpop.f32.mrb[3].mxu0  ;;  %v3320_v12 = vpop.f32.mrb[3].mxu1 }
  0xed   :  { %3436 = vmatmul.mubr.msk.bf16.gmra.mrb[108].mxu0 %vm226_vm3, %v3699_v6  ;;  %3546 = vmatmul.mubr.msk.bf16.gmra.mrb[108].mxu1 %vm226_vm3, %v3700_v7  ;;  %v3709_v6 = vld [vmem:[%s4974_s0 + $0x1c0] sm:$0xff]  }
  0xee   :  { %3439 = vmatprep.mubr.msk.bf16.mxu0 %vm3746_vm0, %v4977_v0  ;;  %3549 = vmatprep.mubr.msk.bf16.mxu1 %vm3746_vm0, %v4977_v0  ;;  %v3710_v7 = vld [vmem:[%s4974_s0 + $0x284] sm:$0xff]  }
  0xf0   :  { %v4155_v13 = vpop.f32.mrb[4].mxu0  ;;  %v4157_v14 = vpop.f32.mrb[4].mxu1 }
  0xf1   :  { %v3213_v16 = vpop.f32.mrb[5].mxu0  ;;  %v3323_v17 = vpop.f32.mrb[5].mxu1 }
  0xf2   :  { %v4167_v20 = vpop.f32.mrb[6].mxu0  ;;  %v4169_v21 = vpop.f32.mrb[6].mxu1 }
  0xf3   :  { %v3214_v23 = vpop.f32.mrb[7].mxu0  ;;  %v3324_v24 = vpop.f32.mrb[7].mxu1 }
  0xf5   :  { %3440 = vmatmul.mubr.msk.bf16.gmra.mrb[112].mxu0 %vm226_vm3, %v3701_v18  ;;  %3550 = vmatmul.mubr.msk.bf16.gmra.mrb[112].mxu1 %vm226_vm3, %v3702_v19 }
  0xf6   :  { %3443 = vmatprep.mubr.msk.bf16.mxu0 %vm3746_vm0, %v4977_v0  ;;  %3553 = vmatprep.mubr.msk.bf16.mxu1 %vm3746_vm0, %v4977_v0 }
  0xf8   :  { %v4179_v25 = vpop.f32.mrb[8].mxu0  ;;  %v4181_v26 = vpop.f32.mrb[8].mxu1 }
  0xf9   :  { %v3217_v28 = vpop.f32.mrb[9].mxu0  ;;  %v3327_v29 = vpop.f32.mrb[9].mxu1 }
  0xfa   :  { %v4191_v32 = vpop.f32.mrb[10].mxu0  ;;  %v4193_v33 = vpop.f32.mrb[10].mxu1 }
  0xfb   :  { %v3218_v35 = vpop.f32.mrb[11].mxu0  ;;  %v3328_v36 = vpop.f32.mrb[11].mxu1 }
  0xfd   :  { %3444 = vmatmul.mubr.msk.bf16.gmra.mrb[116].mxu0 %vm226_vm3, %v3703_v30  ;;  %3554 = vmatmul.mubr.msk.bf16.gmra.mrb[116].mxu1 %vm226_vm3, %v3704_v31  ;;  %v3711_v30 = vld [vmem:[%s4974_s0 + $0x1c8] sm:$0xff]  }
  0xfe   :  { %3447 = vmatprep.mubr.msk.bf16.mxu0 %vm3746_vm0, %v4977_v0  ;;  %3557 = vmatprep.mubr.msk.bf16.mxu1 %vm3746_vm0, %v4977_v0  ;;  %v3712_v31 = vld [vmem:[%s4974_s0 + $0x28c] sm:$0xff]  }
 0x100   :  { %v4203_v37 = vpop.f32.mrb[12].mxu0  ;;  %v4205_v38 = vpop.f32.mrb[12].mxu1 }
 0x101   :  { %v3221_v40 = vpop.f32.mrb[13].mxu0  ;;  %v3331_v41 = vpop.f32.mrb[13].mxu1 }
 0x102   :  { %v4215_v44 = vpop.f32.mrb[14].mxu0  ;;  %v4217_v45 = vpop.f32.mrb[14].mxu1 }
 0x103   :  { %v3222_v47 = vpop.f32.mrb[15].mxu0  ;;  %v3332_v48 = vpop.f32.mrb[15].mxu1 }
 0x105   :  { %3448 = vmatmul.mubr.msk.bf16.gmra.mrb[120].mxu0 %vm226_vm3, %v3705_v42  ;;  %3558 = vmatmul.mubr.msk.bf16.gmra.mrb[120].mxu1 %vm226_vm3, %v3706_v43 }
 0x106   :  { %3451 = vmatprep.mubr.msk.bf16.mxu0 %vm3746_vm0, %v4977_v0  ;;  %3561 = vmatprep.mubr.msk.bf16.mxu1 %vm3746_vm0, %v4977_v0 }
 0x108   :  { %v4227_v49 = vpop.f32.mrb[16].mxu0  ;;  %v4229_v50 = vpop.f32.mrb[16].mxu1 }
 0x109   :  { %v3225_v52 = vpop.f32.mrb[17].mxu0  ;;  %v3335_v53 = vpop.f32.mrb[17].mxu1 }
 0x10a   :  { %v4239_v56 = vpop.f32.mrb[18].mxu0  ;;  %v4241_v57 = vpop.f32.mrb[18].mxu1 }
 0x10b   :  { %v3226_v59 = vpop.f32.mrb[19].mxu0  ;;  %v3336_v60 = vpop.f32.mrb[19].mxu1 }
 0x10d   :  { %3452 = vmatmul.mubr.msk.bf16.gmra.mrb[124].mxu0 %vm226_vm3, %v3707_v54  ;;  %3562 = vmatmul.mubr.msk.bf16.gmra.mrb[124].mxu1 %vm226_vm3, %v3708_v55  ;;  %v3713_v54 = vld [vmem:[%s4974_s0 + $0x1d0] sm:$0xff]  }
 0x10e   :  { %3455 = vmatprep.mubr.msk.bf16.mxu0 %vm3746_vm0, %v4977_v0  ;;  %3565 = vmatprep.mubr.msk.bf16.mxu1 %vm3746_vm0, %v4977_v0  ;;  %v3714_v55 = vld [vmem:[%s4974_s0 + $0x294] sm:$0xff]  }
 0x110   :  { %v4251_v61 = vpop.f32.mrb[20].mxu0  ;;  %v4253_v62 = vpop.f32.mrb[20].mxu1 }
 0x111   :  { %v3229_v4 = vpop.f32.mrb[21].mxu0  ;;  %v3339_v5 = vpop.f32.mrb[21].mxu1 }
 0x112   :  { %v4263_v11 = vpop.f32.mrb[22].mxu0  ;;  %v4265_v12 = vpop.f32.mrb[22].mxu1 }
 0x113   :  { %v3230_v17 = vpop.f32.mrb[23].mxu0  ;;  %v3340_v18 = vpop.f32.mrb[23].mxu1 }
 0x115   :  { %3456 = vmatmul.mubr.msk.bf16.gmra.mrb[128].mxu0 %vm226_vm3, %v3709_v6  ;;  %3566 = vmatmul.mubr.msk.bf16.gmra.mrb[128].mxu1 %vm226_vm3, %v3710_v7 }
 0x116   :  { %3459 = vmatprep.mubr.msk.bf16.mxu0 %vm3746_vm0, %v4977_v0  ;;  %3569 = vmatprep.mubr.msk.bf16.mxu1 %vm3746_vm0, %v4977_v0 }
 0x118   :  { %v4275_v19 = vpop.f32.mrb[24].mxu0  ;;  %v4277_v23 = vpop.f32.mrb[24].mxu1 }
 0x119   :  { %v3233_v28 = vpop.f32.mrb[25].mxu0  ;;  %v3343_v29 = vpop.f32.mrb[25].mxu1 }
 0x11a   :  { %v4287_v35 = vpop.f32.mrb[26].mxu0  ;;  %v4289_v36 = vpop.f32.mrb[26].mxu1 }
 0x11b   :  { %v3234_v41 = vpop.f32.mrb[27].mxu0  ;;  %v3344_v42 = vpop.f32.mrb[27].mxu1 }
 0x11d   :  { %3460 = vmatmul.mubr.msk.bf16.gmra.mrb[132].mxu0 %vm226_vm3, %v3711_v30  ;;  %3570 = vmatmul.mubr.msk.bf16.gmra.mrb[132].mxu1 %vm226_vm3, %v3712_v31  ;;  %v3715_v30 = vld [vmem:[%s4974_s0 + $0x1d8] sm:$0xff]  }
 0x11e   :  { %3463 = vmatprep.mubr.msk.bf16.mxu0 %vm3746_vm0, %v4977_v0  ;;  %3573 = vmatprep.mubr.msk.bf16.mxu1 %vm3746_vm0, %v4977_v0  ;;  %v3716_v31 = vld [vmem:[%s4974_s0 + $0x29c] sm:$0xff]  }
 0x120   :  { %v4299_v43 = vpop.f32.mrb[28].mxu0  ;;  %v4301_v47 = vpop.f32.mrb[28].mxu1 }
 0x121   :  { %v3237_v52 = vpop.f32.mrb[29].mxu0  ;;  %v3347_v53 = vpop.f32.mrb[29].mxu1 }
 0x122   :  { %v4311_v59 = vpop.f32.mrb[30].mxu0  ;;  %v4313_v60 = vpop.f32.mrb[30].mxu1 }
 0x123   :  { %v3238_v5 = vpop.f32.mrb[31].mxu0  ;;  %v3348_v6 = vpop.f32.mrb[31].mxu1 }
 0x125   :  { %3464 = vmatmul.mubr.msk.bf16.gmra.mrb[136].mxu0 %vm226_vm3, %v3713_v54  ;;  %3574 = vmatmul.mubr.msk.bf16.gmra.mrb[136].mxu1 %vm226_vm3, %v3714_v55 }
 0x126   :  { %3467 = vmatprep.mubr.msk.bf16.mxu0 %vm3746_vm0, %v4977_v0  ;;  %3577 = vmatprep.mubr.msk.bf16.mxu1 %vm3746_vm0, %v4977_v0 }
 0x128   :  { %v4323_v7 = vpop.f32.mrb[32].mxu0  ;;  %v4325_v17 = vpop.f32.mrb[32].mxu1 }
 0x129   :  { %v3241_v28 = vpop.f32.mrb[33].mxu0  ;;  %v3351_v29 = vpop.f32.mrb[33].mxu1 }
 0x12a   :  { %v4335_v41 = vpop.f32.mrb[34].mxu0  ;;  %v4337_v42 = vpop.f32.mrb[34].mxu1 }
 0x12b   :  { %v3242_v53 = vpop.f32.mrb[35].mxu0  ;;  %v3352_v54 = vpop.f32.mrb[35].mxu1 }
 0x12d   :  { %3468 = vmatmul.mubr.msk.bf16.gmra.mrb[140].mxu0 %vm226_vm3, %v3715_v30  ;;  %3578 = vmatmul.mubr.msk.bf16.gmra.mrb[140].mxu1 %vm226_vm3, %v3716_v31  ;;  %v3717_v30 = vld [vmem:[%s4974_s0 + $0x1e0] sm:$0xff]  }
 0x12e   :  { %3471 = vmatprep.mubr.msk.bf16.mxu0 %vm3746_vm0, %v4977_v0  ;;  %3581 = vmatprep.mubr.msk.bf16.mxu1 %vm3746_vm0, %v4977_v0  ;;  %v3718_v31 = vld [vmem:[%s4974_s0 + $0x2a4] sm:$0xff]  }
 0x130   :  { %v4347_v55 = vpop.f32.mrb[36].mxu0  ;;  %v4349_v5 = vpop.f32.mrb[36].mxu1 }
 0x131   :  { %v3245_v28 = vpop.f32.mrb[37].mxu0  ;;  %v3355_v29 = vpop.f32.mrb[37].mxu1 }
 0x132   :  { %v4359_v53 = vpop.f32.mrb[38].mxu0  ;;  %v4361_v54 = vpop.f32.mrb[38].mxu1 }
 0x133   :  { %v3246_v18 = vpop.f32.mrb[39].mxu0  ;;  %v3356_v4 = vpop.f32.mrb[39].mxu1 }
 0x134   :  { %v3719_v4 = vld [vmem:[%s4974_s0 + $0x1e8] sm:$0xff]  }
 0x135   :  { %3472 = vmatmul.mubr.msk.bf16.gmra.mrb[144].mxu0 %vm226_vm3, %v3717_v30  ;;  %3582 = vmatmul.mubr.msk.bf16.gmra.mrb[144].mxu1 %vm226_vm3, %v3718_v31  ;;  %v3720_v30 = vld [vmem:[%s4974_s0 + $0x2ac] sm:$0xff]  }
 0x136   :  { %3475 = vmatprep.mubr.msk.bf16.mxu0 %vm3746_vm0, %v4977_v0  ;;  %3585 = vmatprep.mubr.msk.bf16.mxu1 %vm3746_vm0, %v4977_v0 }
 0x138   :  { %v4371_v28 = vpop.f32.mrb[40].mxu0  ;;  %v4373_v29 = vpop.f32.mrb[40].mxu1 }
 0x139   :  { %v3249_v52 = vpop.f32.mrb[41].mxu0  ;;  %v3359_v18 = vpop.f32.mrb[41].mxu1 }
 0x13a   :  { %v4383_v31 = vpop.f32.mrb[42].mxu0  ;;  %v4385_v48 = vpop.f32.mrb[42].mxu1 }
 0x13b   :  { %v3250_v24 = vpop.f32.mrb[43].mxu0  ;;  %v3360_v16 = vpop.f32.mrb[43].mxu1 }
 0x13c   :  { %v3721_v16 = vld [vmem:[%s4974_s0 + $0x1f0] sm:$0xff]  }
 0x13d   :  { %3476 = vmatmul.mubr.msk.bf16.gmra.mrb[148].mxu0 %vm226_vm3, %v3719_v4  ;;  %3586 = vmatmul.mubr.msk.bf16.gmra.mrb[148].mxu1 %vm226_vm3, %v3720_v30  ;;  %v3722_v4 = vld [vmem:[%s4974_s0 + $0x2b4] sm:$0xff]  }
 0x13e   :  { %3479 = vmatprep.mubr.msk.bf16.mxu0 %vm3746_vm0, %v4977_v0  ;;  %3589 = vmatprep.mubr.msk.bf16.mxu1 %vm3746_vm0, %v4977_v0 }
 0x140   :  { %v4395_v52 = vpop.f32.mrb[44].mxu0  ;;  %v4397_v18 = vpop.f32.mrb[44].mxu1 }
 0x141   :  { %v3253_v40 = vpop.f32.mrb[45].mxu0  ;;  %v3363_v24 = vpop.f32.mrb[45].mxu1 }
 0x142   :  { %v4407_v30 = vpop.f32.mrb[46].mxu0  ;;  %v4409_v63 = vpop.f32.mrb[46].mxu1 }
 0x143   :  { %5031 = vst [vmem:[#allocation2_spill] sm:$0xff] %v4407_v30  ;;  %5032 = vst [vmem:[#allocation3_spill] sm:$0xff] %v4409_v63  ;;  %v3254_v51 = vpop.f32.mrb[47].mxu0  ;;  %v3364_v46 = vpop.f32.mrb[47].mxu1 }
 0x144   :  { %v3723_v46 = vld [vmem:[%s4974_s0 + $0x1f8] sm:$0xff]  }
 0x145   :  { %3480 = vmatmul.mubr.msk.bf16.gmra.mrb[152].mxu0 %vm226_vm3, %v3721_v16  ;;  %3590 = vmatmul.mubr.msk.bf16.gmra.mrb[152].mxu1 %vm226_vm3, %v3722_v4  ;;  %v3724_v16 = vld [vmem:[%s4974_s0 + $0x2bc] sm:$0xff]  }
 0x146   :  { %3483 = vmatprep.mubr.msk.bf16.mxu0 %vm3746_vm0, %v4977_v0  ;;  %3593 = vmatprep.mubr.msk.bf16.mxu1 %vm3746_vm0, %v4977_v0 }
 0x148   :  { %v4419_v40 = vpop.f32.mrb[48].mxu0  ;;  %v4421_v24 = vpop.f32.mrb[48].mxu1 }
 0x149   :  { %5033 = vst [vmem:[#allocation4_spill] sm:$0xff] %v4419_v40  ;;  %5034 = vst [vmem:[#allocation5_spill] sm:$0xff] %v4421_v24  ;;  %v3257_v58 = vpop.f32.mrb[49].mxu0  ;;  %v3367_v51 = vpop.f32.mrb[49].mxu1 }
 0x14a   :  { %v4431_v4 = vpop.f32.mrb[50].mxu0  ;;  %v4433_v39 = vpop.f32.mrb[50].mxu1 }
 0x14b   :  { %5035 = vst [vmem:[#allocation6_spill] sm:$0xff] %v4431_v4  ;;  %5036 = vst [vmem:[#allocation7_spill] sm:$0xff] %v4433_v39  ;;  %v3258_v27 = vpop.f32.mrb[51].mxu0  ;;  %v3368_v22 = vpop.f32.mrb[51].mxu1 }
 0x14c   :  { %v3725_v22 = vld [vmem:[%s4974_s0 + $0x200] sm:$0xff]  }
 0x14d   :  { %3484 = vmatmul.mubr.msk.bf16.gmra.mrb[156].mxu0 %vm226_vm3, %v3723_v46  ;;  %3594 = vmatmul.mubr.msk.bf16.gmra.mrb[156].mxu1 %vm226_vm3, %v3724_v16  ;;  %v3726_v46 = vld [vmem:[%s4974_s0 + $0x2c4] sm:$0xff]  }
 0x14e   :  { %3487 = vmatprep.mubr.msk.bf16.mxu0 %vm3746_vm0, %v4977_v0  ;;  %3597 = vmatprep.mubr.msk.bf16.mxu1 %vm3746_vm0, %v4977_v0 }
 0x150   :  { %v4443_v58 = vpop.f32.mrb[52].mxu0  ;;  %v4445_v51 = vpop.f32.mrb[52].mxu1 }
 0x151   :  { %5037 = vst [vmem:[#allocation8_spill] sm:$0xff] %v4443_v58  ;;  %5038 = vst [vmem:[#allocation9_spill] sm:$0xff] %v4445_v51  ;;  %v3261_v34 = vpop.f32.mrb[53].mxu0  ;;  %v3371_v27 = vpop.f32.mrb[53].mxu1 }
 0x152   :  { %v4455_v16 = vpop.f32.mrb[54].mxu0  ;;  %v4457_v15 = vpop.f32.mrb[54].mxu1  ;;  %v5041_v34 = vmov 0.0  }
 0x153   :  { %5039 = vst [vmem:[#allocation10_spill] sm:$0xff] %v4455_v16  ;;  %5040 = vst [vmem:[#allocation11_spill] sm:$0xff] %v4457_v15  ;;  %v3262_v3 = vpop.f32.mrb[55].mxu0  ;;  %v3372_v0 = vpop.f32.mrb[55].mxu1 }
 0x154   :  { %v3727_v0 = vld [vmem:[%s4974_s0 + $0x208] sm:$0xff]  }
 0x155   :  { %3488 = vmatmul.mubr.msk.bf16.gmra.mrb[160].mxu0 %vm226_vm3, %v3725_v22  ;;  %3598 = vmatmul.mubr.msk.bf16.gmra.mrb[160].mxu1 %vm226_vm3, %v3726_v46  ;;  %v3728_v22 = vld [vmem:[%s4974_s0 + $0x2cc] sm:$0xff]  }
 0x156   :  { %3491 = vmatprep.mubr.msk.bf16.mxu0 %vm3746_vm0, %v5041_v34  ;;  %3601 = vmatprep.mubr.msk.bf16.mxu1 %vm3746_vm0, %v5041_v34 }
 0x158   :  { %v4467_v27 = vpop.f32.mrb[56].mxu0  ;;  %v4469_v6 = vpop.f32.mrb[56].mxu1 }
 0x159   :  { %5042 = vst [vmem:[#allocation12_spill] sm:$0xff] %v4467_v27  ;;  %5043 = vst [vmem:[#allocation13_spill] sm:$0xff] %v4469_v6  ;;  %v3265_v10 = vpop.f32.mrb[57].mxu0  ;;  %v3375_v3 = vpop.f32.mrb[57].mxu1 }
 0x15a   :  { %v4479_v46 = vpop.f32.mrb[58].mxu0  ;;  %v4481_v15 = vpop.f32.mrb[58].mxu1 }
 0x15b   :  { %5044 = vst [vmem:[#allocation14_spill] sm:$0xff] %v4479_v46  ;;  %5045 = vst [vmem:[#allocation15_spill] sm:$0xff] %v4481_v15  ;;  %v3266_v58 = vpop.f32.mrb[59].mxu0  ;;  %v3376_v39 = vpop.f32.mrb[59].mxu1 }
 0x15c   :  { %v3729_v39 = vld [vmem:[%s4974_s0 + $0x210] sm:$0xff]  }
 0x15d   :  { %3492 = vmatmul.mubr.msk.bf16.gmra.mrb[164].mxu0 %vm226_vm3, %v3727_v0  ;;  %3602 = vmatmul.mubr.msk.bf16.gmra.mrb[164].mxu1 %vm226_vm3, %v3728_v22  ;;  %v3730_v0 = vld [vmem:[%s4974_s0 + $0x2d4] sm:$0xff]  }
 0x15e   :  { %3495 = vmatprep.mubr.msk.bf16.mxu0 %vm3746_vm0, %v5041_v34  ;;  %3605 = vmatprep.mubr.msk.bf16.mxu1 %vm3746_vm0, %v5041_v34 }
 0x160   :  { %v4491_v10 = vpop.f32.mrb[60].mxu0  ;;  %v4493_v3 = vpop.f32.mrb[60].mxu1 }
 0x161   :  { %5046 = vst [vmem:[#allocation16_spill] sm:$0xff] %v4491_v10  ;;  %5047 = vst [vmem:[#allocation17_spill] sm:$0xff] %v4493_v3  ;;  %v3269_v16 = vpop.f32.mrb[61].mxu0  ;;  %v3379_v58 = vpop.f32.mrb[61].mxu1 }
 0x162   :  { %v4503_v22 = vpop.f32.mrb[62].mxu0  ;;  %v4505_v15 = vpop.f32.mrb[62].mxu1 }
 0x163   :  { %5048 = vst [vmem:[#allocation18_spill] sm:$0xff] %v4503_v22  ;;  %5049 = vst [vmem:[#allocation19_spill] sm:$0xff] %v4505_v15  ;;  %v3270_v6 = vpop.f32.mrb[63].mxu0  ;;  %v3380_v27 = vpop.f32.mrb[63].mxu1 }
 0x164   :  { %v3731_v27 = vld [vmem:[%s4974_s0 + $0x218] sm:$0xff]  }
 0x165   :  { %3496 = vmatmul.mubr.msk.bf16.gmra.mrb[168].mxu0 %vm226_vm3, %v3729_v39  ;;  %3606 = vmatmul.mubr.msk.bf16.gmra.mrb[168].mxu1 %vm226_vm3, %v3730_v0  ;;  %v3732_v39 = vld [vmem:[%s4974_s0 + $0x2dc] sm:$0xff]  }
 0x166   :  { %3499 = vmatprep.mubr.msk.bf16.mxu0 %vm3746_vm0, %v5041_v34  ;;  %3609 = vmatprep.mubr.msk.bf16.mxu1 %vm3746_vm0, %v5041_v34 }
 0x168   :  { %v4515_v16 = vpop.f32.mrb[64].mxu0  ;;  %v4517_v58 = vpop.f32.mrb[64].mxu1 }
 0x169   :  { %5050 = vst [vmem:[#allocation20_spill] sm:$0xff] %v4515_v16  ;;  %5051 = vst [vmem:[#allocation21_spill] sm:$0xff] %v4517_v58  ;;  %v3273_v46 = vpop.f32.mrb[65].mxu0  ;;  %v3383_v6 = vpop.f32.mrb[65].mxu1 }
 0x16a   :  { %v4527_v0 = vpop.f32.mrb[66].mxu0  ;;  %v4529_v15 = vpop.f32.mrb[66].mxu1 }
 0x16b   :  { %5052 = vst [vmem:[#allocation22_spill] sm:$0xff] %v4527_v0  ;;  %5053 = vst [vmem:[#allocation23_spill] sm:$0xff] %v4529_v15  ;;  %v3274_v3 = vpop.f32.mrb[67].mxu0  ;;  %v3384_v10 = vpop.f32.mrb[67].mxu1 }
 0x16c   :  { %v3733_v10 = vld [vmem:[%s4974_s0 + $0x220] sm:$0xff]  }
 0x16d   :  { %3500 = vmatmul.mubr.msk.bf16.gmra.mrb[172].mxu0 %vm226_vm3, %v3731_v27  ;;  %3610 = vmatmul.mubr.msk.bf16.gmra.mrb[172].mxu1 %vm226_vm3, %v3732_v39  ;;  %v3734_v27 = vld [vmem:[%s4974_s0 + $0x2e4] sm:$0xff]  }
 0x16e   :  { %3503 = vmatprep.mubr.msk.bf16.mxu0 %vm3746_vm0, %v5041_v34  ;;  %3613 = vmatprep.mubr.msk.bf16.mxu1 %vm3746_vm0, %v5041_v34 }
 0x170   :  { %v4539_v46 = vpop.f32.mrb[68].mxu0  ;;  %v4541_v6 = vpop.f32.mrb[68].mxu1 }
 0x171   :  { %5054 = vst [vmem:[#allocation24_spill] sm:$0xff] %v4539_v46  ;;  %5055 = vst [vmem:[#allocation25_spill] sm:$0xff] %v4541_v6  ;;  %v3277_v22 = vpop.f32.mrb[69].mxu0  ;;  %v3387_v3 = vpop.f32.mrb[69].mxu1 }
 0x172   :  { %v4551_v39 = vpop.f32.mrb[70].mxu0  ;;  %v4553_v15 = vpop.f32.mrb[70].mxu1 }
 0x173   :  { %5056 = vst [vmem:[#allocation26_spill] sm:$0xff] %v4551_v39  ;;  %5057 = vst [vmem:[#allocation27_spill] sm:$0xff] %v4553_v15  ;;  %v3278_v58 = vpop.f32.mrb[71].mxu0  ;;  %v3388_v16 = vpop.f32.mrb[71].mxu1 }
 0x174   :  { %v3735_v16 = vld [vmem:[%s4974_s0 + $0x228] sm:$0xff]  }
 0x175   :  { %3504 = vmatmul.mubr.msk.bf16.gmra.mrb[176].mxu0 %vm226_vm3, %v3733_v10  ;;  %3614 = vmatmul.mubr.msk.bf16.gmra.mrb[176].mxu1 %vm226_vm3, %v3734_v27  ;;  %v3736_v10 = vld [vmem:[%s4974_s0 + $0x2ec] sm:$0xff]  }
 0x176   :  { %3507 = vmatprep.mubr.msk.bf16.mxu0 %vm3746_vm0, %v5041_v34  ;;  %3617 = vmatprep.mubr.msk.bf16.mxu1 %vm3746_vm0, %v5041_v34 }
 0x178   :  { %v4563_v22 = vpop.f32.mrb[72].mxu0  ;;  %v4565_v3 = vpop.f32.mrb[72].mxu1 }
 0x179   :  { %5058 = vst [vmem:[#allocation28_spill] sm:$0xff] %v4563_v22  ;;  %5059 = vst [vmem:[#allocation29_spill] sm:$0xff] %v4565_v3  ;;  %v3281_v0 = vpop.f32.mrb[73].mxu0  ;;  %v3391_v58 = vpop.f32.mrb[73].mxu1 }
 0x17a   :  { %v4575_v27 = vpop.f32.mrb[74].mxu0  ;;  %v4577_v15 = vpop.f32.mrb[74].mxu1 }
 0x17b   :  { %5060 = vst [vmem:[#allocation30_spill] sm:$0xff] %v4575_v27  ;;  %5061 = vst [vmem:[#allocation31_spill] sm:$0xff] %v4577_v15  ;;  %v3282_v6 = vpop.f32.mrb[75].mxu0  ;;  %v3392_v46 = vpop.f32.mrb[75].mxu1 }
 0x17c   :  { %v3737_v46 = vld [vmem:[%s4974_s0 + $0x230] sm:$0xff]  }
 0x17d   :  { %3508 = vmatmul.mubr.msk.bf16.gmra.mrb[180].mxu0 %vm226_vm3, %v3735_v16  ;;  %3618 = vmatmul.mubr.msk.bf16.gmra.mrb[180].mxu1 %vm226_vm3, %v3736_v10  ;;  %v3738_v16 = vld [vmem:[%s4974_s0 + $0x2f4] sm:$0xff]  }
 0x17e   :  { %3511 = vmatprep.mubr.msk.bf16.mxu0 %vm3746_vm0, %v5041_v34  ;;  %3621 = vmatprep.mubr.msk.bf16.mxu1 %vm3746_vm0, %v5041_v34 }
 0x180   :  { %v4587_v0 = vpop.f32.mrb[76].mxu0  ;;  %v4589_v58 = vpop.f32.mrb[76].mxu1 }
 0x181   :  { %5062 = vst [vmem:[#allocation32_spill] sm:$0xff] %v4587_v0  ;;  %5063 = vst [vmem:[#allocation33_spill] sm:$0xff] %v4589_v58  ;;  %v3285_v39 = vpop.f32.mrb[77].mxu0  ;;  %v3395_v6 = vpop.f32.mrb[77].mxu1 }
 0x182   :  { %v4599_v10 = vpop.f32.mrb[78].mxu0  ;;  %v4601_v15 = vpop.f32.mrb[78].mxu1 }
 0x183   :  { %5064 = vst [vmem:[#allocation34_spill] sm:$0xff] %v4599_v10  ;;  %5065 = vst [vmem:[#allocation35_spill] sm:$0xff] %v4601_v15  ;;  %v3286_v3 = vpop.f32.mrb[79].mxu0  ;;  %v3396_v22 = vpop.f32.mrb[79].mxu1 }
 0x184   :  { %v3739_v22 = vld [vmem:[%s4974_s0 + $0x238] sm:$0xff]  }
 0x185   :  { %3512 = vmatmul.mubr.msk.bf16.gmra.mrb[184].mxu0 %vm226_vm3, %v3737_v46  ;;  %3622 = vmatmul.mubr.msk.bf16.gmra.mrb[184].mxu1 %vm226_vm3, %v3738_v16  ;;  %v3740_v46 = vld [vmem:[%s4974_s0 + $0x2fc] sm:$0xff]  }
 0x186   :  { %3515 = vmatprep.mubr.msk.bf16.mxu0 %vm3746_vm0, %v5041_v34  ;;  %3625 = vmatprep.mubr.msk.bf16.mxu1 %vm3746_vm0, %v5041_v34 }
 0x188   :  { %v4611_v39 = vpop.f32.mrb[80].mxu0  ;;  %v4613_v6 = vpop.f32.mrb[80].mxu1 }
 0x189   :  { %5066 = vst [vmem:[#allocation36_spill] sm:$0xff] %v4611_v39  ;;  %5067 = vst [vmem:[#allocation37_spill] sm:$0xff] %v4613_v6  ;;  %v3289_v27 = vpop.f32.mrb[81].mxu0  ;;  %v3399_v3 = vpop.f32.mrb[81].mxu1 }
 0x18a   :  { %v4623_v16 = vpop.f32.mrb[82].mxu0  ;;  %v4625_v15 = vpop.f32.mrb[82].mxu1 }
 0x18b   :  { %5068 = vst [vmem:[#allocation38_spill] sm:$0xff] %v4623_v16  ;;  %5069 = vst [vmem:[#allocation39_spill] sm:$0xff] %v4625_v15  ;;  %v3290_v58 = vpop.f32.mrb[83].mxu0  ;;  %v3400_v0 = vpop.f32.mrb[83].mxu1 }
 0x18c   :  { %v3741_v0 = vld [vmem:[%s4974_s0 + $0x240] sm:$0xff]  }
 0x18d   :  { %3516 = vmatmul.mubr.msk.bf16.gmra.mrb[188].mxu0 %vm226_vm3, %v3739_v22  ;;  %3626 = vmatmul.mubr.msk.bf16.gmra.mrb[188].mxu1 %vm226_vm3, %v3740_v46  ;;  %v3742_v22 = vld [vmem:[%s4974_s0 + $0x304] sm:$0xff]  }
 0x18e   :  { %3519 = vmatprep.mubr.msk.bf16.mxu0 %vm3746_vm0, %v5041_v34  ;;  %3629 = vmatprep.mubr.msk.bf16.mxu1 %vm3746_vm0, %v5041_v34 }
 0x190   :  { %v4635_v27 = vpop.f32.mrb[84].mxu0  ;;  %v4637_v3 = vpop.f32.mrb[84].mxu1 }
 0x191   :  { %5070 = vst [vmem:[#allocation40_spill] sm:$0xff] %v4635_v27  ;;  %5071 = vst [vmem:[#allocation41_spill] sm:$0xff] %v4637_v3  ;;  %v3293_v10 = vpop.f32.mrb[85].mxu0  ;;  %v3403_v58 = vpop.f32.mrb[85].mxu1 }
 0x192   :  { %v4647_v46 = vpop.f32.mrb[86].mxu0  ;;  %v4649_v15 = vpop.f32.mrb[86].mxu1 }
 0x193   :  { %5072 = vst [vmem:[#allocation42_spill] sm:$0xff] %v4647_v46  ;;  %5073 = vst [vmem:[#allocation43_spill] sm:$0xff] %v4649_v15  ;;  %v3294_v6 = vpop.f32.mrb[87].mxu0  ;;  %v3404_v39 = vpop.f32.mrb[87].mxu1 }
 0x194   :  { %v3743_v39 = vld [vmem:[%s4974_s0 + $0x248] ss:$0 sps:$4 sm:$0xff]  }
 0x195   :  { %3520 = vmatmul.mubr.msk.bf16.gmra.mrb[192].mxu0 %vm226_vm3, %v3741_v0  ;;  %3630 = vmatmul.mubr.msk.bf16.gmra.mrb[192].mxu1 %vm226_vm3, %v3742_v22  ;;  %v3744_v0 = vld [vmem:[%s4974_s0 + $0x30c] ss:$0 sps:$4 sm:$0xff]  }
 0x196   :  { %3523 = vmatprep.mubr.msk.bf16.mxu0 %vm3746_vm0, %v5041_v34  ;;  %3633 = vmatprep.mubr.msk.bf16.mxu1 %vm3746_vm0, %v5041_v34 }
 0x198   :  { %v4659_v10 = vpop.f32.mrb[88].mxu0  ;;  %v4661_v58 = vpop.f32.mrb[88].mxu1 }
 0x199   :  { %5074 = vst [vmem:[#allocation44_spill] sm:$0xff] %v4659_v10  ;;  %5075 = vst [vmem:[#allocation45_spill] sm:$0xff] %v4661_v58  ;;  %v3297_v16 = vpop.f32.mrb[89].mxu0  ;;  %v3407_v6 = vpop.f32.mrb[89].mxu1 }
 0x19a   :  { %v4671_v22 = vpop.f32.mrb[90].mxu0  ;;  %v4673_v34 = vpop.f32.mrb[90].mxu1 }
 0x19b   :  { %5076 = vst [vmem:[#allocation46_spill] sm:$0xff] %v4671_v22  ;;  %5077 = vst [vmem:[#allocation47_spill] sm:$0xff] %v4673_v34  ;;  %v3298_v46 = vpop.f32.mrb[91].mxu0  ;;  %v3408_v3 = vpop.f32.mrb[91].mxu1 }
 0x19c   :  { %v5084_v3 = vmax.f32 %v4131_v1, %v4133_v2 }
 0x19d   :  { %3524 = vmatmul.mubr.msk.bf16.gmra.mrb[196].mxu0 %vm226_vm3, %v3743_v39  ;;  %3634 = vmatmul.mubr.msk.bf16.gmra.mrb[196].mxu1 %vm226_vm3, %v3744_v0 }
 0x1a0   :  { %v4679_v16 = vpop.f32.mrb[92].mxu0  ;;  %v4681_v6 = vpop.f32.mrb[92].mxu1 }
 0x1a1   :  { %5078 = vst [vmem:[#allocation48_spill] sm:$0xff] %v4679_v16  ;;  %5079 = vst [vmem:[#allocation49_spill] sm:$0xff] %v4681_v6  ;;  %v3301_v58 = vpop.f32.mrb[93].mxu0  ;;  %v3411_v10 = vpop.f32.mrb[93].mxu1 }
 0x1a2   :  { %v4685_v27 = vpop.f32.mrb[94].mxu0  ;;  %v4687_v4 = vpop.f32.mrb[94].mxu1 }
 0x1a3   :  { %5080 = vst [vmem:[#allocation50_spill] sm:$0xff] %v4685_v27  ;;  %5081 = vst [vmem:[#allocation51_spill] sm:$0xff] %v4687_v4  ;;  %v3302_v46 = vpop.f32.mrb[95].mxu0  ;;  %v3412_v39 = vpop.f32.mrb[95].mxu1  ;;  %v4703_v27 = vld [vmem:[%s4975_s2] ss:$0 sm:$0xff] }
 0x1a8   :  { %v4691_v15 = vpop.f32.mrb[96].mxu0  ;;  %v4693_v0 = vpop.f32.mrb[96].mxu1 }
 0x1a9   :  { %5082 = vst [vmem:[#allocation52_spill] sm:$0xff] %v4691_v15  ;;  %5083 = vst [vmem:[#allocation53_spill] sm:$0xff] %v4693_v0  ;;  %v3305_v22 = vpop.f32.mrb[97].mxu0  ;;  %v3415_v51 = vpop.f32.mrb[97].mxu1  ;;  %v5086_v15 = vmax.f32 %v4155_v13, %v4157_v14 }
 0x1aa   :  { %v538_v58 = vpop.f32.mrb[98].mxu0  ;;  %v1018_v10 = vpop.f32.mrb[98].mxu1 }
 0x1ab   :  { %v3306_v6 = vpop.f32.mrb[99].mxu0  ;;  %v3416_v16 = vpop.f32.mrb[99].mxu1 }
 0x1ac   :  { %v5085_v6 = vmax.f32 %v4143_v8, %v4145_v9 }
 0x1b0   :  { %v1352_v24 = vpop.f32.mrb[100].mxu0  ;;  %v1881_v40 = vpop.f32.mrb[100].mxu1 }
 0x1b1   :  { %v1550_v46 = vmax.f32 %v5084_v3, %v1352_v24  ;;  %v3429_v39 = vpop.f32.mrb[101].mxu0  ;;  %v3539_v4 = vpop.f32.mrb[101].mxu1 }
 0x1b2   :  { %v1355_v34 = vpop.f32.mrb[102].mxu0  ;;  %v1884_v22 = vpop.f32.mrb[102].mxu1 }
 0x1b3   :  { %v2079_v51 = vmax.f32 %v1550_v46, %v1881_v40  ;;  %v1551_v16 = vmax.f32 %v5085_v6, %v1355_v34  ;;  %v3430_v58 = vpop.f32.mrb[103].mxu0  ;;  %v3540_v10 = vpop.f32.mrb[103].mxu1 }
 0x1b5   :  { %v2135_v0 = vadd.f32 %v4703_v27, %v2079_v51  ;;  %v2080_v1 = vmax.f32 %v1551_v16, %v1884_v22  ;;  %v5087_v51 = vmax.f32 %v4167_v20, %v4169_v21 }
 0x1b7   :  { %v2136_v2 = vadd.f32 %v4703_v27, %v2080_v1  ;;  %v2184_v3 = vmax.f32 %v2135_v0, 0.0 }
 0x1b8   :  { %v1360_v24 = vpop.f32.mrb[104].mxu0  ;;  %v1889_v4 = vpop.f32.mrb[104].mxu1 }
 0x1b9   :  { %v2185_v39 = vmax.f32 %v2136_v2, 0.0  ;;  %v1552_v63 = vmax.f32 %v5086_v15, %v1360_v24  ;;  %v3433_v40 = vpop.f32.mrb[105].mxu0  ;;  %v3543_v46 = vpop.f32.mrb[105].mxu1 }
 0x1ba   :  { %v1363_v30 = vpop.f32.mrb[106].mxu0  ;;  %v1892_v8 = vpop.f32.mrb[106].mxu1 }
 0x1bb   :  { %v2937_v9 = vpack.c.bf16 %v2185_v39, %v2184_v3  ;;  %v2081_v34 = vmax.f32 %v1552_v63, %v1889_v4  ;;  %v1553_v22 = vmax.f32 %v5087_v51, %v1363_v30  ;;  %v3434_v6 = vpop.f32.mrb[107].mxu0  ;;  %v3544_v16 = vpop.f32.mrb[107].mxu1  ;;  %v5088_v63 = vmax.f32 %v4179_v25, %v4181_v26 }
 0x1bc   :  { %v5089_v39 = vmax.f32 %v4191_v32, %v4193_v33  ;;  %v5090_v16 = vmax.f32 %v4203_v37, %v4205_v38 }
 0x1bd   :  { %2938 = vst [vmem:[%s4976_s3] sm:$0xff] %v2937_v9   ;;  %v2137_v0 = vadd.f32 %v4703_v27, %v2081_v34  ;;  %v2082_v13 = vmax.f32 %v1553_v22, %v1892_v8 }
 0x1bf   :  { %v2138_v14 = vadd.f32 %v4703_v27, %v2082_v13  ;;  %v2186_v10 = vmax.f32 %v2137_v0, 0.0 }
 0x1c0   :  { %v1368_v15 = vpop.f32.mrb[108].mxu0  ;;  %v1897_v58 = vpop.f32.mrb[108].mxu1 }
 0x1c1   :  { %v2187_v1 = vmax.f32 %v2138_v14, 0.0  ;;  %v1554_v20 = vmax.f32 %v5088_v63, %v1368_v15  ;;  %v3437_v21 = vpop.f32.mrb[109].mxu0  ;;  %v3547_v30 = vpop.f32.mrb[109].mxu1 }
 0x1c2   :  { %v1371_v2 = vpop.f32.mrb[110].mxu0  ;;  %v1900_v24 = vpop.f32.mrb[110].mxu1 }
 0x1c3   :  { %v2942_v4 = vpack.c.bf16 %v2187_v1, %v2186_v10  ;;  %v2083_v3 = vmax.f32 %v1554_v20, %v1897_v58  ;;  %v1555_v40 = vmax.f32 %v5089_v39, %v1371_v2  ;;  %v3438_v46 = vpop.f32.mrb[111].mxu0  ;;  %v3548_v8 = vpop.f32.mrb[111].mxu1  ;;  %v5091_v10 = vmax.f32 %v4215_v44, %v4217_v45 }
 0x1c5   :  { %3054 = vst [vmem:[%s4976_s3 + $0x8] sm:$0xff] %v2942_v4   ;;  %v2139_v9 = vadd.f32 %v4703_v27, %v2083_v3  ;;  %v2084_v25 = vmax.f32 %v1555_v40, %v1900_v24  ;;  %v5092_v3 = vmax.f32 %v4227_v49, %v4229_v50 }
 0x1c7   :  { %v2140_v26 = vadd.f32 %v4703_v27, %v2084_v25  ;;  %v2188_v22 = vmax.f32 %v2139_v9, 0.0  ;;  %v5093_v25 = vmax.f32 %v4239_v56, %v4241_v57 }
 0x1c8   :  { %v1376_v34 = vpop.f32.mrb[112].mxu0  ;;  %v1905_v51 = vpop.f32.mrb[112].mxu1 }
 0x1c9   :  { %v2189_v6 = vmax.f32 %v2140_v26, 0.0  ;;  %v1556_v32 = vmax.f32 %v5090_v16, %v1376_v34  ;;  %v3441_v33 = vpop.f32.mrb[113].mxu0  ;;  %v3551_v0 = vpop.f32.mrb[113].mxu1 }
 0x1ca   :  { %v1379_v13 = vpop.f32.mrb[114].mxu0  ;;  %v1908_v14 = vpop.f32.mrb[114].mxu1  ;;  %v5094_v0 = vmax.f32 %v4251_v61, %v4253_v62 }
 0x1cb   :  { %v2947_v15 = vpack.c.bf16 %v2189_v6, %v2188_v22  ;;  %v2085_v58 = vmax.f32 %v1556_v32, %v1905_v51  ;;  %v1557_v1 = vmax.f32 %v5091_v10, %v1379_v13  ;;  %v3442_v63 = vpop.f32.mrb[115].mxu0  ;;  %v3552_v20 = vpop.f32.mrb[115].mxu1 }
 0x1cd   :  { %3055 = vst [vmem:[%s4976_s3 + $0x10] sm:$0xff] %v2947_v15   ;;  %v2141_v21 = vadd.f32 %v4703_v27, %v2085_v58  ;;  %v2086_v37 = vmax.f32 %v1557_v1, %v1908_v14  ;;  %v5095_v1 = vmax.f32 %v4263_v11, %v4265_v12 }
 0x1cf   :  { %v2142_v38 = vadd.f32 %v4703_v27, %v2086_v37  ;;  %v2190_v24 = vmax.f32 %v2141_v21, 0.0 }
 0x1d0   :  { %v1384_v30 = vpop.f32.mrb[116].mxu0  ;;  %v1913_v2 = vpop.f32.mrb[116].mxu1 }
 0x1d1   :  { %v2191_v4 = vmax.f32 %v2142_v38, 0.0  ;;  %v1558_v44 = vmax.f32 %v5092_v3, %v1384_v30  ;;  %v3445_v45 = vpop.f32.mrb[117].mxu0  ;;  %v3555_v39 = vpop.f32.mrb[117].mxu1 }
 0x1d2   :  { %v1387_v40 = vpop.f32.mrb[118].mxu0  ;;  %v1916_v46 = vpop.f32.mrb[118].mxu1 }
 0x1d3   :  { %v2952_v8 = vpack.c.bf16 %v2191_v4, %v2190_v24  ;;  %v2087_v9 = vmax.f32 %v1558_v44, %v1913_v2  ;;  %v1559_v26 = vmax.f32 %v5093_v25, %v1387_v40  ;;  %v3446_v34 = vpop.f32.mrb[119].mxu0  ;;  %v3556_v51 = vpop.f32.mrb[119].mxu1  ;;  %v5096_v4 = vmax.f32 %v4275_v19, %v4277_v23 }
 0x1d5   :  { %3056 = vst [vmem:[%s4976_s3 + $0x18] sm:$0xff] %v2952_v8   ;;  %v2143_v22 = vadd.f32 %v4703_v27, %v2087_v9  ;;  %v2088_v49 = vmax.f32 %v1559_v26, %v1916_v46  ;;  %v5097_v46 = vmax.f32 %v4287_v35, %v4289_v36 }
 0x1d7   :  { %v2144_v50 = vadd.f32 %v4703_v27, %v2088_v49  ;;  %v2192_v32 = vmax.f32 %v2143_v22, 0.0 }
 0x1d8   :  { %v1392_v6 = vpop.f32.mrb[120].mxu0  ;;  %v1921_v16 = vpop.f32.mrb[120].mxu1 }
 0x1d9   :  { %v2193_v33 = vmax.f32 %v2144_v50, 0.0  ;;  %v1560_v56 = vmax.f32 %v5094_v0, %v1392_v6  ;;  %v3449_v57 = vpop.f32.mrb[121].mxu0  ;;  %v3559_v13 = vpop.f32.mrb[121].mxu1  ;;  %v5098_v50 = vmax.f32 %v4299_v43, %v4301_v47 }
 0x1da   :  { %v1395_v14 = vpop.f32.mrb[122].mxu0  ;;  %v1924_v15 = vpop.f32.mrb[122].mxu1 }
 0x1db   :  { %v2957_v58 = vpack.c.bf16 %v2193_v33, %v2192_v32  ;;  %v2089_v10 = vmax.f32 %v1560_v56, %v1921_v16  ;;  %v1561_v63 = vmax.f32 %v5095_v1, %v1395_v14  ;;  %v3450_v20 = vpop.f32.mrb[123].mxu0  ;;  %v3560_v21 = vpop.f32.mrb[123].mxu1  ;;  %v5099_v56 = vmax.f32 %v4311_v59, %v4313_v60 }
 0x1dc   :  { %v5100_v20 = vmax.f32 %v4323_v7, %v4325_v17 }
 0x1dd   :  { %3057 = vst [vmem:[%s4976_s3 + $0x20] sm:$0xff] %v2957_v58   ;;  %v2145_v37 = vadd.f32 %v4703_v27, %v2089_v10  ;;  %v2090_v61 = vmax.f32 %v1561_v63, %v1924_v15 }
 0x1df   :  { %v2146_v62 = vadd.f32 %v4703_v27, %v2090_v61  ;;  %v2194_v2 = vmax.f32 %v2145_v37, 0.0 }
 0x1e0   :  { %v1400_v38 = vpop.f32.mrb[124].mxu0  ;;  %v1929_v30 = vpop.f32.mrb[124].mxu1 }
 0x1e1   :  { %v2195_v24 = vmax.f32 %v2146_v62, 0.0  ;;  %v1562_v11 = vmax.f32 %v5096_v4, %v1400_v38  ;;  %v3453_v12 = vpop.f32.mrb[125].mxu0  ;;  %v3563_v3 = vpop.f32.mrb[125].mxu1 }
 0x1e2   :  { %v1403_v44 = vpop.f32.mrb[126].mxu0  ;;  %v1932_v45 = vpop.f32.mrb[126].mxu1 }
 0x1e3   :  { %v2962_v39 = vpack.c.bf16 %v2195_v24, %v2194_v2  ;;  %v2091_v40 = vmax.f32 %v1562_v11, %v1929_v30  ;;  %v1563_v8 = vmax.f32 %v5097_v46, %v1403_v44  ;;  %v3454_v9 = vpop.f32.mrb[127].mxu0  ;;  %v3564_v25 = vpop.f32.mrb[127].mxu1  ;;  %v5101_v30 = vmax.f32 %v4335_v41, %v4337_v42 }
 0x1e5   :  { %3058 = vst [vmem:[%s4976_s3 + $0x28] sm:$0xff] %v2962_v39   ;;  %v2147_v26 = vadd.f32 %v4703_v27, %v2091_v40  ;;  %v2092_v19 = vmax.f32 %v1563_v8, %v1932_v45  ;;  %v5102_v39 = vmax.f32 %v4347_v55, %v4349_v5 }
 0x1e7   :  { %v2148_v23 = vadd.f32 %v4703_v27, %v2092_v19  ;;  %v2196_v22 = vmax.f32 %v2147_v26, 0.0  ;;  %v5103_v26 = vmax.f32 %v4359_v53, %v4361_v54 }
 0x1e8   :  { %v1408_v34 = vpop.f32.mrb[128].mxu0  ;;  %v1937_v51 = vpop.f32.mrb[128].mxu1 }
 0x1e9   :  { %v2197_v49 = vmax.f32 %v2148_v23, 0.0  ;;  %v1564_v35 = vmax.f32 %v5098_v50, %v1408_v34  ;;  %v3457_v36 = vpop.f32.mrb[129].mxu0  ;;  %v3567_v6 = vpop.f32.mrb[129].mxu1 }
 0x1ea   :  { %v1411_v16 = vpop.f32.mrb[130].mxu0  ;;  %v1940_v32 = vpop.f32.mrb[130].mxu1  ;;  %v5104_v36 = vmax.f32 %v4371_v28, %v4373_v29 }
 0x1eb   :  { %v2967_v33 = vpack.c.bf16 %v2197_v49, %v2196_v22  ;;  %v2093_v0 = vmax.f32 %v1564_v35, %v1937_v51  ;;  %v1565_v57 = vmax.f32 %v5099_v56, %v1411_v16  ;;  %v3458_v13 = vpop.f32.mrb[131].mxu0  ;;  %v3568_v14 = vpop.f32.mrb[131].mxu1  ;;  %v5105_v56 = vmax.f32 %v4383_v31, %v4385_v48 }
 0x1ed   :  { %3059 = vst [vmem:[%s4976_s3 + $0x30] sm:$0xff] %v2967_v33   ;;  %v2149_v15 = vadd.f32 %v4703_v27, %v2093_v0  ;;  %v2094_v43 = vmax.f32 %v1565_v57, %v1940_v32 }
 0x1ef   :  { %v2150_v47 = vadd.f32 %v4703_v27, %v2094_v43  ;;  %v2198_v1 = vmax.f32 %v2149_v15, 0.0 }
 0x1f0   :  { %v1416_v58 = vpop.f32.mrb[132].mxu0  ;;  %v1945_v10 = vpop.f32.mrb[132].mxu1 }
 0x1f1   :  { %v2199_v63 = vmax.f32 %v2150_v47, 0.0  ;;  %v1566_v59 = vmax.f32 %v5100_v20, %v1416_v58  ;;  %v3461_v60 = vpop.f32.mrb[133].mxu0  ;;  %v3571_v21 = vpop.f32.mrb[133].mxu1 }
 0x1f2   :  { %v1419_v37 = vpop.f32.mrb[134].mxu0  ;;  %v1948_v61 = vpop.f32.mrb[134].mxu1 }
 0x1f3   :  { %v2972_v62 = vpack.c.bf16 %v2199_v63, %v2198_v1  ;;  %v2095_v38 = vmax.f32 %v1566_v59, %v1945_v10  ;;  %v1567_v2 = vmax.f32 %v5101_v30, %v1419_v37  ;;  %v3462_v24 = vpop.f32.mrb[135].mxu0  ;;  %v3572_v4 = vpop.f32.mrb[135].mxu1  ;;  %v5106_v1 = vmax.f32 %v4395_v52, %v4397_v18  ;;  %v5107_v37 = vld [vmem:[#allocation2_spill] sm:$0xff] }
 0x1f5   :  { %3060 = vst [vmem:[%s4976_s3 + $0x38] sm:$0xff] %v2972_v62   ;;  %v2151_v11 = vadd.f32 %v4703_v27, %v2095_v38  ;;  %v2096_v7 = vmax.f32 %v1567_v2, %v1948_v61  ;;  %v5108_v61 = vld [vmem:[#allocation3_spill] sm:$0xff] }
 0x1f6   :  { %v5109_v62 = vmax.f32 %v5107_v37, %v5108_v61 }
 0x1f7   :  { %v2152_v17 = vadd.f32 %v4703_v27, %v2096_v7  ;;  %v2200_v44 = vmax.f32 %v2151_v11, 0.0 }
 0x1f8   :  { %v1424_v12 = vpop.f32.mrb[136].mxu0  ;;  %v1953_v3 = vpop.f32.mrb[136].mxu1 }
 0x1f9   :  { %v2201_v45 = vmax.f32 %v2152_v17, 0.0  ;;  %v1568_v41 = vmax.f32 %v5102_v39, %v1424_v12  ;;  %v3465_v42 = vpop.f32.mrb[137].mxu0  ;;  %v3575_v40 = vpop.f32.mrb[137].mxu1  ;;  %v5110_v12 = vld [vmem:[#allocation4_spill] sm:$0xff] }
 0x1fa   :  { %v1427_v46 = vpop.f32.mrb[138].mxu0  ;;  %v1956_v8 = vpop.f32.mrb[138].mxu1 }
 0x1fb   :  { %v2977_v9 = vpack.c.bf16 %v2201_v45, %v2200_v44  ;;  %v2097_v25 = vmax.f32 %v1568_v41, %v1953_v3  ;;  %v1569_v19 = vmax.f32 %v5103_v26, %v1427_v46  ;;  %v3466_v23 = vpop.f32.mrb[139].mxu0  ;;  %v3576_v34 = vpop.f32.mrb[139].mxu1  ;;  %v5111_v3 = vld [vmem:[#allocation5_spill] sm:$0xff] }
 0x1fc   :  { %v5112_v44 = vmax.f32 %v5110_v12, %v5111_v3 }
 0x1fd   :  { %3061 = vst [vmem:[%s4976_s3 + $0x40] sm:$0xff] %v2977_v9   ;;  %v2153_v51 = vadd.f32 %v4703_v27, %v2097_v25  ;;  %v2098_v55 = vmax.f32 %v1569_v19, %v1956_v8  ;;  %v5113_v9 = vld [vmem:[#allocation6_spill] sm:$0xff]  ;;  %v5114_v25 = vld [vmem:[#allocation7_spill] sm:$0xff] }
 0x1fe   :  { %v5115_v26 = vmax.f32 %v5113_v9, %v5114_v25 }
 0x1ff   :  { %v2154_v5 = vadd.f32 %v4703_v27, %v2098_v55  ;;  %v2202_v50 = vmax.f32 %v2153_v51, 0.0 }
 0x200   :  { %v1432_v22 = vpop.f32.mrb[140].mxu0  ;;  %v1961_v49 = vpop.f32.mrb[140].mxu1 }
 0x201   :  { %v2203_v35 = vmax.f32 %v2154_v5, 0.0  ;;  %v1570_v53 = vmax.f32 %v5104_v36, %v1432_v22  ;;  %v3469_v54 = vpop.f32.mrb[141].mxu0  ;;  %v3579_v6 = vpop.f32.mrb[141].mxu1  ;;  %v5116_v36 = vld [vmem:[#allocation8_spill] sm:$0xff] }
 0x202   :  { %v1435_v16 = vpop.f32.mrb[142].mxu0  ;;  %v1964_v32 = vpop.f32.mrb[142].mxu1 }
 0x203   :  { %v2982_v33 = vpack.c.bf16 %v2203_v35, %v2202_v50  ;;  %v2099_v0 = vmax.f32 %v1570_v53, %v1961_v49  ;;  %v1571_v57 = vmax.f32 %v5105_v56, %v1435_v16  ;;  %v3470_v13 = vpop.f32.mrb[143].mxu0  ;;  %v3580_v14 = vpop.f32.mrb[143].mxu1  ;;  %v5117_v53 = vld [vmem:[#allocation9_spill] sm:$0xff] }
 0x204   :  { %v5118_v54 = vmax.f32 %v5116_v36, %v5117_v53  ;;  %v5119_v13 = vld [vmem:[#allocation10_spill] sm:$0xff]  ;;  %v5120_v14 = vld [vmem:[#allocation11_spill] sm:$0xff] }
 0x205   :  { %3062 = vst [vmem:[%s4976_s3 + $0x48] sm:$0xff] %v2982_v33   ;;  %v2155_v15 = vadd.f32 %v4703_v27, %v2099_v0  ;;  %v2100_v28 = vmax.f32 %v1571_v57, %v1964_v32 }
 0x207   :  { %v2156_v29 = vadd.f32 %v4703_v27, %v2100_v28  ;;  %v2204_v58 = vmax.f32 %v2155_v15, 0.0  ;;  %v5121_v15 = vmax.f32 %v5119_v13, %v5120_v14 }
 0x208   :  { %v1440_v43 = vpop.f32.mrb[144].mxu0  ;;  %v1969_v47 = vpop.f32.mrb[144].mxu1 }
 0x209   :  { %v2205_v10 = vmax.f32 %v2156_v29, 0.0  ;;  %v1572_v48 = vmax.f32 %v5106_v1, %v1440_v43  ;;  %v3473_v31 = vpop.f32.mrb[145].mxu0  ;;  %v3583_v63 = vpop.f32.mrb[145].mxu1 }
 0x20a   :  { %v1443_v20 = vpop.f32.mrb[146].mxu0  ;;  %v1972_v59 = vpop.f32.mrb[146].mxu1 }
 0x20b   :  { %v2987_v60 = vpack.c.bf16 %v2205_v10, %v2204_v58  ;;  %v2101_v21 = vmax.f32 %v1572_v48, %v1969_v47  ;;  %v1573_v38 = vmax.f32 %v5109_v62, %v1443_v20  ;;  %v3474_v30 = vpop.f32.mrb[147].mxu0  ;;  %v3584_v2 = vpop.f32.mrb[147].mxu1  ;;  %v5122_v20 = vld [vmem:[#allocation12_spill] sm:$0xff] }
 0x20d   :  { %3063 = vst [vmem:[%s4976_s3 + $0x50] sm:$0xff] %v2987_v60   ;;  %v2157_v24 = vadd.f32 %v4703_v27, %v2101_v21  ;;  %v2102_v52 = vmax.f32 %v1573_v38, %v1972_v59  ;;  %v5123_v59 = vld [vmem:[#allocation13_spill] sm:$0xff] }
 0x20e   :  { %v5124_v60 = vmax.f32 %v5122_v20, %v5123_v59 }
 0x20f   :  { %v2158_v18 = vadd.f32 %v4703_v27, %v2102_v52  ;;  %v2206_v7 = vmax.f32 %v2157_v24, 0.0  ;;  %v5125_v24 = vld [vmem:[#allocation14_spill] sm:$0xff]  ;;  %v5126_v52 = vld [vmem:[#allocation15_spill] sm:$0xff] }
 0x210   :  { %v1448_v4 = vpop.f32.mrb[148].mxu0  ;;  %v1977_v11 = vpop.f32.mrb[148].mxu1 }
 0x211   :  { %v2207_v17 = vmax.f32 %v2158_v18, 0.0  ;;  %v1574_v45 = vmax.f32 %v5112_v44, %v1448_v4  ;;  %v3477_v39 = vpop.f32.mrb[149].mxu0  ;;  %v3587_v41 = vpop.f32.mrb[149].mxu1  ;;  %v5127_v18 = vmax.f32 %v5125_v24, %v5126_v52 }
 0x212   :  { %v1451_v42 = vpop.f32.mrb[150].mxu0  ;;  %v1980_v40 = vpop.f32.mrb[150].mxu1 }
 0x213   :  { %v2992_v46 = vpack.c.bf16 %v2207_v17, %v2206_v7  ;;  %v2103_v8 = vmax.f32 %v1574_v45, %v1977_v11  ;;  %v1575_v19 = vmax.f32 %v5115_v26, %v1451_v42  ;;  %v3478_v23 = vpop.f32.mrb[151].mxu0  ;;  %v3588_v34 = vpop.f32.mrb[151].mxu1  ;;  %v5128_v42 = vld [vmem:[#allocation16_spill] sm:$0xff] }
 0x215   :  { %3064 = vst [vmem:[%s4976_s3 + $0x58] sm:$0xff] %v2992_v46   ;;  %v2159_v51 = vadd.f32 %v4703_v27, %v2103_v8  ;;  %v2104_v55 = vmax.f32 %v1575_v19, %v1980_v40  ;;  %v5129_v40 = vld [vmem:[#allocation17_spill] sm:$0xff] }
 0x216   :  { %v5130_v46 = vmax.f32 %v5128_v42, %v5129_v40 }
 0x217   :  { %v2160_v5 = vadd.f32 %v4703_v27, %v2104_v55  ;;  %v2208_v50 = vmax.f32 %v2159_v51, 0.0  ;;  %v5131_v51 = vld [vmem:[#allocation18_spill] sm:$0xff]  ;;  %v5132_v55 = vld [vmem:[#allocation19_spill] sm:$0xff] }
 0x218   :  { %v1456_v22 = vpop.f32.mrb[152].mxu0  ;;  %v1985_v49 = vpop.f32.mrb[152].mxu1 }
 0x219   :  { %v2209_v35 = vmax.f32 %v2160_v5, 0.0  ;;  %v1576_v6 = vmax.f32 %v5118_v54, %v1456_v22  ;;  %v3481_v16 = vpop.f32.mrb[153].mxu0  ;;  %v3591_v32 = vpop.f32.mrb[153].mxu1  ;;  %v5133_v5 = vmax.f32 %v5131_v51, %v5132_v55 }
 0x21a   :  { %v1459_v33 = vpop.f32.mrb[154].mxu0  ;;  %v1988_v0 = vpop.f32.mrb[154].mxu1 }
 0x21b   :  { %v2997_v56 = vpack.c.bf16 %v2209_v35, %v2208_v50  ;;  %v2105_v57 = vmax.f32 %v1576_v6, %v1985_v49  ;;  %v1577_v28 = vmax.f32 %v5121_v15, %v1459_v33  ;;  %v3482_v29 = vpop.f32.mrb[155].mxu0  ;;  %v3592_v43 = vpop.f32.mrb[155].mxu1  ;;  %v5134_v33 = vld [vmem:[#allocation20_spill] sm:$0xff] }
 0x21d   :  { %3065 = vst [vmem:[%s4976_s3 + $0x60] sm:$0xff] %v2997_v56   ;;  %v2161_v47 = vadd.f32 %v4703_v27, %v2105_v57  ;;  %v2106_v58 = vmax.f32 %v1577_v28, %v1988_v0  ;;  %v5135_v0 = vld [vmem:[#allocation21_spill] sm:$0xff] }
 0x21e   :  { %v5136_v56 = vmax.f32 %v5134_v33, %v5135_v0 }
 0x21f   :  { %v2162_v10 = vadd.f32 %v4703_v27, %v2106_v58  ;;  %v2210_v31 = vmax.f32 %v2161_v47, 0.0  ;;  %v5137_v47 = vld [vmem:[#allocation22_spill] sm:$0xff]  ;;  %v5138_v58 = vld [vmem:[#allocation23_spill] sm:$0xff] }
 0x220   :  { %v1464_v1 = vpop.f32.mrb[156].mxu0  ;;  %v1993_v48 = vpop.f32.mrb[156].mxu1 }
 0x221   :  { %v2211_v63 = vmax.f32 %v2162_v10, 0.0  ;;  %v1578_v21 = vmax.f32 %v5124_v60, %v1464_v1  ;;  %v3485_v37 = vpop.f32.mrb[157].mxu0  ;;  %v3595_v61 = vpop.f32.mrb[157].mxu1  ;;  %v5139_v10 = vmax.f32 %v5137_v47, %v5138_v58 }
 0x222   :  { %v1467_v62 = vpop.f32.mrb[158].mxu0  ;;  %v1996_v38 = vpop.f32.mrb[158].mxu1 }
 0x223   :  { %v3002_v30 = vpack.c.bf16 %v2211_v63, %v2210_v31  ;;  %v2107_v2 = vmax.f32 %v1578_v21, %v1993_v48  ;;  %v1579_v4 = vmax.f32 %v5127_v18, %v1467_v62  ;;  %v3486_v11 = vpop.f32.mrb[159].mxu0  ;;  %v3596_v7 = vpop.f32.mrb[159].mxu1  ;;  %v5140_v62 = vld [vmem:[#allocation24_spill] sm:$0xff] }
 0x225   :  { %3066 = vst [vmem:[%s4976_s3 + $0x68] sm:$0xff] %v3002_v30   ;;  %v2163_v17 = vadd.f32 %v4703_v27, %v2107_v2  ;;  %v2108_v12 = vmax.f32 %v1579_v4, %v1996_v38  ;;  %v5141_v38 = vld [vmem:[#allocation25_spill] sm:$0xff] }
 0x226   :  { %v5142_v30 = vmax.f32 %v5140_v62, %v5141_v38 }
 0x227   :  { %v2164_v3 = vadd.f32 %v4703_v27, %v2108_v12  ;;  %v2212_v39 = vmax.f32 %v2163_v17, 0.0  ;;  %v5143_v17 = vld [vmem:[#allocation26_spill] sm:$0xff]  ;;  %v5144_v12 = vld [vmem:[#allocation27_spill] sm:$0xff] }
 0x228   :  { %v1472_v44 = vpop.f32.mrb[160].mxu0  ;;  %v2001_v45 = vpop.f32.mrb[160].mxu1 }
 0x229   :  { %v2213_v41 = vmax.f32 %v2164_v3, 0.0  ;;  %v1580_v8 = vmax.f32 %v5130_v46, %v1472_v44  ;;  %v3489_v9 = vpop.f32.mrb[161].mxu0  ;;  %v3599_v25 = vpop.f32.mrb[161].mxu1  ;;  %v5145_v3 = vmax.f32 %v5143_v17, %v5144_v12 }
 0x22a   :  { %v1475_v26 = vpop.f32.mrb[162].mxu0  ;;  %v2004_v19 = vpop.f32.mrb[162].mxu1 }
 0x22b   :  { %v3007_v23 = vpack.c.bf16 %v2213_v41, %v2212_v39  ;;  %v2109_v34 = vmax.f32 %v1580_v8, %v2001_v45  ;;  %v1581_v22 = vmax.f32 %v5133_v5, %v1475_v26  ;;  %v3490_v49 = vpop.f32.mrb[163].mxu0  ;;  %v3600_v50 = vpop.f32.mrb[163].mxu1  ;;  %v5146_v26 = vld [vmem:[#allocation28_spill] sm:$0xff] }
 0x22d   :  { %3067 = vst [vmem:[%s4976_s3 + $0x70] sm:$0xff] %v3007_v23   ;;  %v2165_v35 = vadd.f32 %v4703_v27, %v2109_v34  ;;  %v2110_v36 = vmax.f32 %v1581_v22, %v2004_v19  ;;  %v5147_v19 = vld [vmem:[#allocation29_spill] sm:$0xff] }
 0x22e   :  { %v5148_v23 = vmax.f32 %v5146_v26, %v5147_v19 }
 0x22f   :  { %v2166_v53 = vadd.f32 %v4703_v27, %v2110_v36  ;;  %v2214_v16 = vmax.f32 %v2165_v35, 0.0  ;;  %v5149_v35 = vld [vmem:[#allocation30_spill] sm:$0xff]  ;;  %v5150_v36 = vld [vmem:[#allocation31_spill] sm:$0xff] }
 0x230   :  { %v1480_v54 = vpop.f32.mrb[164].mxu0  ;;  %v2009_v6 = vpop.f32.mrb[164].mxu1 }
 0x231   :  { %v2215_v32 = vmax.f32 %v2166_v53, 0.0  ;;  %v1582_v57 = vmax.f32 %v5136_v56, %v1480_v54  ;;  %v3493_v13 = vpop.f32.mrb[165].mxu0  ;;  %v3603_v14 = vpop.f32.mrb[165].mxu1  ;;  %v5151_v53 = vmax.f32 %v5149_v35, %v5150_v36 }
 0x232   :  { %v1483_v15 = vpop.f32.mrb[166].mxu0  ;;  %v2012_v28 = vpop.f32.mrb[166].mxu1 }
 0x233   :  { %v3012_v29 = vpack.c.bf16 %v2215_v32, %v2214_v16  ;;  %v2111_v43 = vmax.f32 %v1582_v57, %v2009_v6  ;;  %v1583_v1 = vmax.f32 %v5139_v10, %v1483_v15  ;;  %v3494_v48 = vpop.f32.mrb[167].mxu0  ;;  %v3604_v31 = vpop.f32.mrb[167].mxu1  ;;  %v5152_v15 = vld [vmem:[#allocation32_spill] sm:$0xff] }
 0x235   :  { %3068 = vst [vmem:[%s4976_s3 + $0x78] sm:$0xff] %v3012_v29   ;;  %v2167_v63 = vadd.f32 %v4703_v27, %v2111_v43  ;;  %v2112_v20 = vmax.f32 %v1583_v1, %v2012_v28  ;;  %v5153_v28 = vld [vmem:[#allocation33_spill] sm:$0xff] }
 0x236   :  { %v5154_v29 = vmax.f32 %v5152_v15, %v5153_v28 }
 0x237   :  { %v2168_v59 = vadd.f32 %v4703_v27, %v2112_v20  ;;  %v2216_v37 = vmax.f32 %v2167_v63, 0.0  ;;  %v5155_v63 = vld [vmem:[#allocation34_spill] sm:$0xff]  ;;  %v5156_v20 = vld [vmem:[#allocation35_spill] sm:$0xff] }
 0x238   :  { %v1488_v60 = vpop.f32.mrb[168].mxu0  ;;  %v2017_v21 = vpop.f32.mrb[168].mxu1 }
 0x239   :  { %v2217_v61 = vmax.f32 %v2168_v59, 0.0  ;;  %v1584_v2 = vmax.f32 %v5142_v30, %v1488_v60  ;;  %v3497_v24 = vpop.f32.mrb[169].mxu0  ;;  %v3607_v52 = vpop.f32.mrb[169].mxu1  ;;  %v5157_v59 = vmax.f32 %v5155_v63, %v5156_v20 }
 0x23a   :  { %v1491_v18 = vpop.f32.mrb[170].mxu0  ;;  %v2020_v4 = vpop.f32.mrb[170].mxu1 }
 0x23b   :  { %v3017_v11 = vpack.c.bf16 %v2217_v61, %v2216_v37  ;;  %v2113_v7 = vmax.f32 %v1584_v2, %v2017_v21  ;;  %v1585_v44 = vmax.f32 %v5145_v3, %v1491_v18  ;;  %v3498_v45 = vpop.f32.mrb[171].mxu0  ;;  %v3608_v39 = vpop.f32.mrb[171].mxu1  ;;  %v5158_v18 = vld [vmem:[#allocation36_spill] sm:$0xff] }
 0x23d   :  { %3069 = vst [vmem:[%s4976_s3 + $0x80] sm:$0xff] %v3017_v11   ;;  %v2169_v41 = vadd.f32 %v4703_v27, %v2113_v7  ;;  %v2114_v42 = vmax.f32 %v1585_v44, %v2020_v4  ;;  %v5159_v4 = vld [vmem:[#allocation37_spill] sm:$0xff] }
 0x23e   :  { %v5160_v11 = vmax.f32 %v5158_v18, %v5159_v4 }
 0x23f   :  { %v2170_v40 = vadd.f32 %v4703_v27, %v2114_v42  ;;  %v2218_v9 = vmax.f32 %v2169_v41, 0.0  ;;  %v5161_v41 = vld [vmem:[#allocation38_spill] sm:$0xff]  ;;  %v5162_v42 = vld [vmem:[#allocation39_spill] sm:$0xff] }
 0x240   :  { %v1496_v46 = vpop.f32.mrb[172].mxu0  ;;  %v2025_v8 = vpop.f32.mrb[172].mxu1 }
 0x241   :  { %v2219_v25 = vmax.f32 %v2170_v40, 0.0  ;;  %v1586_v34 = vmax.f32 %v5148_v23, %v1496_v46  ;;  %v3501_v51 = vpop.f32.mrb[173].mxu0  ;;  %v3611_v55 = vpop.f32.mrb[173].mxu1  ;;  %v5163_v40 = vmax.f32 %v5161_v41, %v5162_v42 }
 0x242   :  { %v1499_v5 = vpop.f32.mrb[174].mxu0  ;;  %v2028_v22 = vpop.f32.mrb[174].mxu1 }
 0x243   :  { %v3022_v49 = vpack.c.bf16 %v2219_v25, %v2218_v9  ;;  %v2115_v50 = vmax.f32 %v1586_v34, %v2025_v8  ;;  %v1587_v54 = vmax.f32 %v5151_v53, %v1499_v5  ;;  %v3502_v6 = vpop.f32.mrb[175].mxu0  ;;  %v3612_v16 = vpop.f32.mrb[175].mxu1  ;;  %v5164_v5 = vld [vmem:[#allocation40_spill] sm:$0xff] }
 0x245   :  { %3070 = vst [vmem:[%s4976_s3 + $0x88] sm:$0xff] %v3022_v49   ;;  %v2171_v32 = vadd.f32 %v4703_v27, %v2115_v50  ;;  %v2116_v33 = vmax.f32 %v1587_v54, %v2028_v22  ;;  %v5165_v22 = vld [vmem:[#allocation41_spill] sm:$0xff] }
 0x246   :  { %v5166_v49 = vmax.f32 %v5164_v5, %v5165_v22 }
 0x247   :  { %v2172_v0 = vadd.f32 %v4703_v27, %v2116_v33  ;;  %v2220_v13 = vmax.f32 %v2171_v32, 0.0  ;;  %v5167_v32 = vld [vmem:[#allocation42_spill] sm:$0xff]  ;;  %v5168_v33 = vld [vmem:[#allocation43_spill] sm:$0xff] }
 0x248   :  { %v1504_v56 = vpop.f32.mrb[176].mxu0  ;;  %v2033_v57 = vpop.f32.mrb[176].mxu1 }
 0x249   :  { %v2221_v14 = vmax.f32 %v2172_v0, 0.0  ;;  %v1588_v43 = vmax.f32 %v5154_v29, %v1504_v56  ;;  %v3505_v47 = vpop.f32.mrb[177].mxu0  ;;  %v3615_v58 = vpop.f32.mrb[177].mxu1  ;;  %v5169_v0 = vmax.f32 %v5167_v32, %v5168_v33 }
 0x24a   :  { %v1507_v10 = vpop.f32.mrb[178].mxu0  ;;  %v2036_v1 = vpop.f32.mrb[178].mxu1 }
 0x24b   :  { %v3027_v48 = vpack.c.bf16 %v2221_v14, %v2220_v13  ;;  %v2117_v31 = vmax.f32 %v1588_v43, %v2033_v57  ;;  %v1589_v60 = vmax.f32 %v5157_v59, %v1507_v10  ;;  %v3506_v21 = vpop.f32.mrb[179].mxu0  ;;  %v3616_v37 = vpop.f32.mrb[179].mxu1  ;;  %v5170_v10 = vld [vmem:[#allocation44_spill] sm:$0xff] }
 0x24d   :  { %3071 = vst [vmem:[%s4976_s3 + $0x90] sm:$0xff] %v3027_v48   ;;  %v2173_v61 = vadd.f32 %v4703_v27, %v2117_v31  ;;  %v2118_v62 = vmax.f32 %v1589_v60, %v2036_v1  ;;  %v5171_v1 = vld [vmem:[#allocation45_spill] sm:$0xff] }
 0x24e   :  { %v5172_v48 = vmax.f32 %v5170_v10, %v5171_v1 }
 0x24f   :  { %v2174_v38 = vadd.f32 %v4703_v27, %v2118_v62  ;;  %v2222_v24 = vmax.f32 %v2173_v61, 0.0  ;;  %v5173_v61 = vld [vmem:[#allocation46_spill] sm:$0xff]  ;;  %v5174_v62 = vld [vmem:[#allocation47_spill] sm:$0xff] }
 0x250   :  { %v1512_v30 = vpop.f32.mrb[180].mxu0  ;;  %v2041_v2 = vpop.f32.mrb[180].mxu1 }
 0x251   :  { %v2223_v52 = vmax.f32 %v2174_v38, 0.0  ;;  %v1590_v7 = vmax.f32 %v5160_v11, %v1512_v30  ;;  %v3509_v17 = vpop.f32.mrb[181].mxu0  ;;  %v3619_v12 = vpop.f32.mrb[181].mxu1  ;;  %v5175_v38 = vmax.f32 %v5173_v61, %v5174_v62 }
 0x252   :  { %v1515_v3 = vpop.f32.mrb[182].mxu0  ;;  %v2044_v44 = vpop.f32.mrb[182].mxu1 }
 0x253   :  { %v3032_v45 = vpack.c.bf16 %v2223_v52, %v2222_v24  ;;  %v2119_v39 = vmax.f32 %v1590_v7, %v2041_v2  ;;  %v1591_v46 = vmax.f32 %v5163_v40, %v1515_v3  ;;  %v3510_v8 = vpop.f32.mrb[183].mxu0  ;;  %v3620_v9 = vpop.f32.mrb[183].mxu1  ;;  %v5176_v3 = vld [vmem:[#allocation48_spill] sm:$0xff] }
 0x255   :  { %3072 = vst [vmem:[%s4976_s3 + $0x98] sm:$0xff] %v3032_v45   ;;  %v2175_v25 = vadd.f32 %v4703_v27, %v2119_v39  ;;  %v2120_v26 = vmax.f32 %v1591_v46, %v2044_v44  ;;  %v5177_v44 = vld [vmem:[#allocation49_spill] sm:$0xff] }
 0x256   :  { %v5178_v45 = vmax.f32 %v5176_v3, %v5177_v44 }
 0x257   :  { %v2176_v19 = vadd.f32 %v4703_v27, %v2120_v26  ;;  %v2224_v51 = vmax.f32 %v2175_v25, 0.0  ;;  %v5179_v25 = vld [vmem:[#allocation50_spill] sm:$0xff]  ;;  %v5180_v26 = vld [vmem:[#allocation51_spill] sm:$0xff] }
 0x258   :  { %v1520_v23 = vpop.f32.mrb[184].mxu0  ;;  %v2049_v34 = vpop.f32.mrb[184].mxu1 }
 0x259   :  { %v2225_v55 = vmax.f32 %v2176_v19, 0.0  ;;  %v1592_v50 = vmax.f32 %v5166_v49, %v1520_v23  ;;  %v3513_v35 = vpop.f32.mrb[185].mxu0  ;;  %v3623_v36 = vpop.f32.mrb[185].mxu1  ;;  %v5181_v19 = vmax.f32 %v5179_v25, %v5180_v26 }
 0x25a   :  { %v1523_v53 = vpop.f32.mrb[186].mxu0  ;;  %v2052_v54 = vpop.f32.mrb[186].mxu1 }
 0x25b   :  { %v3037_v6 = vpack.c.bf16 %v2225_v55, %v2224_v51  ;;  %v2121_v16 = vmax.f32 %v1592_v50, %v2049_v34  ;;  %v1593_v56 = vmax.f32 %v5169_v0, %v1523_v53  ;;  %v3514_v57 = vpop.f32.mrb[187].mxu0  ;;  %v3624_v13 = vpop.f32.mrb[187].mxu1  ;;  %v5182_v53 = vld [vmem:[#allocation52_spill] sm:$0xff] }
 0x25d   :  { %3073 = vst [vmem:[%s4976_s3 + $0xa0] sm:$0xff] %v3037_v6   ;;  %v2177_v14 = vadd.f32 %v4703_v27, %v2121_v16  ;;  %v2122_v15 = vmax.f32 %v1593_v56, %v2052_v54  ;;  %v5183_v54 = vld [vmem:[#allocation53_spill] sm:$0xff] }
 0x25e   :  { %v5184_v6 = vmax.f32 %v5182_v53, %v5183_v54 }
 0x25f   :  { %v2178_v28 = vadd.f32 %v4703_v27, %v2122_v15  ;;  %v2226_v47 = vmax.f32 %v2177_v14, 0.0 }
 0x260   :  { %v1528_v29 = vpop.f32.mrb[188].mxu0  ;;  %v2057_v43 = vpop.f32.mrb[188].mxu1 }
 0x261   :  { %v2227_v58 = vmax.f32 %v2178_v28, 0.0  ;;  %v1594_v31 = vmax.f32 %v5172_v48, %v1528_v29  ;;  %v3517_v63 = vpop.f32.mrb[189].mxu0  ;;  %v3627_v20 = vpop.f32.mrb[189].mxu1 }
 0x262   :  { %v1531_v59 = vpop.f32.mrb[190].mxu0  ;;  %v2060_v60 = vpop.f32.mrb[190].mxu1 }
 0x263   :  { %v3042_v21 = vpack.c.bf16 %v2227_v58, %v2226_v47  ;;  %v2123_v37 = vmax.f32 %v1594_v31, %v2057_v43  ;;  %v1595_v30 = vmax.f32 %v5175_v38, %v1531_v59  ;;  %v3518_v2 = vpop.f32.mrb[191].mxu0  ;;  %v3628_v24 = vpop.f32.mrb[191].mxu1 }
 0x265   :  { %3074 = vst [vmem:[%s4976_s3 + $0xa8] sm:$0xff] %v3042_v21   ;;  %v2179_v52 = vadd.f32 %v4703_v27, %v2123_v37  ;;  %v2124_v18 = vmax.f32 %v1595_v30, %v2060_v60 }
 0x267   :  { %v2180_v4 = vadd.f32 %v4703_v27, %v2124_v18  ;;  %v2228_v17 = vmax.f32 %v2179_v52, 0.0 }
 0x268   :  { %v1536_v11 = vpop.f32.mrb[192].mxu0  ;;  %v2065_v7 = vpop.f32.mrb[192].mxu1 }
 0x269   :  { %v2229_v12 = vmax.f32 %v2180_v4, 0.0  ;;  %v1596_v39 = vmax.f32 %v5178_v45, %v1536_v11  ;;  %v3521_v41 = vpop.f32.mrb[193].mxu0  ;;  %v3631_v42 = vpop.f32.mrb[193].mxu1 }
 0x26a   :  { %v1539_v40 = vpop.f32.mrb[194].mxu0  ;;  %v2068_v46 = vpop.f32.mrb[194].mxu1 }
 0x26b   :  { %v3047_v8 = vpack.c.bf16 %v2229_v12, %v2228_v17  ;;  %v2125_v9 = vmax.f32 %v1596_v39, %v2065_v7  ;;  %v1597_v23 = vmax.f32 %v5181_v19, %v1539_v40  ;;  %v3522_v34 = vpop.f32.mrb[195].mxu0  ;;  %v3632_v51 = vpop.f32.mrb[195].mxu1 }
 0x26d   :  { %3075 = vst [vmem:[%s4976_s3 + $0xb0] sm:$0xff] %v3047_v8   ;;  %v2181_v55 = vadd.f32 %v4703_v27, %v2125_v9  ;;  %v2126_v5 = vmax.f32 %v1597_v23, %v2068_v46 }
 0x26f   :  { %v2182_v22 = vadd.f32 %v4703_v27, %v2126_v5  ;;  %v2230_v35 = vmax.f32 %v2181_v55, 0.0 }
 0x270   :  { %v1544_v49 = vpop.f32.mrb[196].mxu0  ;;  %v2073_v50 = vpop.f32.mrb[196].mxu1 }
 0x271   :  { %v2231_v36 = vmax.f32 %v2182_v22, 0.0  ;;  %v1598_v16 = vmax.f32 %v5184_v6, %v1544_v49  ;;  %v3525_v32 = vpop.f32.mrb[197].mxu0  ;;  %v3635_v33 = vpop.f32.mrb[197].mxu1 }
 0x272   :  { %v1547_v0 = vpop.f32.mrb[198].mxu0  ;;  %v2076_v56 = vpop.f32.mrb[198].mxu1 }
 0x273   :  { %v3052_v57 = vpack.c.bf16 %v2231_v36, %v2230_v35  ;;  %v2127_v13 = vmax.f32 %v1598_v16, %v2073_v50  ;;  %v3526_v14 = vpop.f32.mrb[199].mxu0  ;;  %v3636_v15 = vpop.f32.mrb[199].mxu1 }
 0x275   :  { %3076 = vst [vmem:[%s4976_s3 + $0xb8] sm:$0xff] %v3052_v57   ;;  %v2183_v28 = vadd.f32 %v4703_v27, %v2127_v13 }
 0x277   :  { %v2232_v29 = vmax.f32 %v2183_v28, 0.0 }
 0x279   :  { %v2933_v43 = vpack.c.bf16 %v2232_v29, %v2232_v29 }
 0x27b   :  { %2478 = vst [vmem:[%s4976_s3 + $0xc0] sm:$0xf] %v2933_v43 }

// kernel: lenet_forward.4
= control target key start
LH: loop header
LB: loop body
LE: loop exit
PB: predicated region body
PF: predicated region fallthrough
CT: control target
= control target key end

     0   :  { %v811_v0 = vmov 0   ;;  %vm131_vm0 = vcmask 179200   ;;  %vm144_vm1 = vcmask 1042432   ;;  %s1086_s1 = inlined_call_operand.vmem [shape: bf16[150,128], index: 1, kind: input, shape index: {}]   ;;  %s1087_s0 = inlined_call_operand.vmem [shape: bf16[4,50,150], index: 0, kind: input, shape index: {}]   ;;  %s1088_s2 = inlined_call_operand.vmem [shape: f32[1,128], index: 2, kind: input, shape index: {}]   ;;  %s1089_s3 = inlined_call_operand.vmem [shape: bf16[50,128], index: 3, kind: output, shape index: {}]  }
   0x1   :  { %148 = vmatprep.subr.bf16.mxu0 %v811_v0  ;;  %265 = vmatprep.subr.bf16.mxu1 %v811_v0  ;;  %v837_v1 = vld [vmem:[%s1086_s1] sm:$0xff]   ;;  %v844_v2 = vld [vmem:[%s1086_s1 + $0x8] sm:$0xff]   ;;  %v853_v3 = vld [vmem:[%s1086_s1 + $0x10] sm:$0xff]  }
   0x2   :  { %149 = vmatpush1.bf16.msra.mxu0 %v837_v1  ;;  %266 = vmatpush1.bf16.msra.mxu1 %v837_v1  ;;  %v862_v4 = vld [vmem:[%s1086_s1 + $0x18] sm:$0xff]   ;;  %v769_v5 = vld [vmem:[%s1087_s0 + $0x4] ss:$8 sps:$4 sm:$0xff]   ;;  %v897_v9 = vld [vmem:[%s1086_s1 + $0x30] sm:$0xff]  }
   0x3   :  { %150 = vmatprep.subr.bf16.mxu0 %v811_v0  ;;  %267 = vmatprep.subr.bf16.mxu1 %v811_v0  ;;  %v772_v6 = vld [vmem:[%s1087_s0 + $0x3c] ss:$8 sps:$4 sm:$0xff]   ;;  %v888_v8 = vld [vmem:[%s1086_s1 + $0x28] sm:$0xff]   ;;  %v770_v15 = vld [vmem:[%s1087_s0 + $0x38] ss:$8 sps:$4 sm:$0xff]  }
   0x4   :  { %663 = vmatprep.mubr.msk.bf16.mxu0 %vm131_vm0, %v769_v5  ;;  %v878_v7 = vld [vmem:[%s1086_s1 + $0x20] sm:$0xff]   ;;  %682 = vmatprep.mubr.msk.bf16.mxu1 %vm131_vm0, %v772_v6  ;;  %v906_v10 = vld [vmem:[%s1086_s1 + $0x38] sm:$0xff]   ;;  %v766_v12 = vld [vmem:[%s1086_s1 + $0x48] ss:$0 sps:$4 sm:$0x77]  }
   0x5   :  { %v915_v11 = vld [vmem:[%s1086_s1 + $0x40] sm:$0xff]   ;;  %v926_v13 = vsel %vm144_vm1, %v766_v12, 0  ;;  %v773_v16 = vld [vmem:[%s1087_s0 + $0x14] ss:$8 sps:$4 sm:$0xff]   ;;  %v775_v18 = vld [vmem:[%s1087_s0 + $0x10] ss:$8 sps:$4 sm:$0xff]  }
   0x6   :  { %151 = vmatpush1.bf16.msra.mxu0 %v844_v2  ;;  %268 = vmatpush1.bf16.msra.mxu1 %v844_v2  ;;  %v767_v14 = vld [vmem:[%s1087_s0] ss:$8 sps:$4 sm:$0xff]   ;;  %v776_v17 = vld [vmem:[%s1087_s0 + $0x4c] ss:$8 sps:$4 sm:$0xff]   ;;  %v782_v21 = vld [vmem:[%s1087_s0 + $0x5c] ss:$8 sps:$4 sm:$0xff]  }
   0x7   :  { %152 = vmatprep.subr.bf16.mxu0 %v811_v0  ;;  %269 = vmatprep.subr.bf16.mxu1 %v811_v0  ;;  %v778_v19 = vld [vmem:[%s1087_s0 + $0x48] ss:$8 sps:$4 sm:$0xff]   ;;  %v779_v20 = vld [vmem:[%s1087_s0 + $0x24] ss:$8 sps:$4 sm:$0xff]   ;;  %v784_v23 = vld [vmem:[%s1087_s0 + $0x58] ss:$8 sps:$4 sm:$0xff]  }
   0x8   :  { %v781_v22 = vld [vmem:[%s1087_s0 + $0x20] ss:$8 sps:$4 sm:$0xff]   ;;  %v40_v24 = vld [vmem:[%s1087_s0 + $0x30] sm:$0x11]  ;;  %v795_v34 = vld [vmem:[%s1087_s0 + $0x84] ss:$8 sps:$4 sm:$0xff]  }
   0x9   :  { %v673_v25 = vld [vmem:[%s1087_s0 + $0x68] sm:$0x11]  ;;  %v652_v26 = vcombine.high %v40_v24, %v40_v24  ;;  %v651_v28 = vcombine.low %v40_v24, %v40_v24  ;;  %v791_v30 = vld [vmem:[%s1087_s0 + $0x74] ss:$8 sps:$4 sm:$0xff]   ;;  %v789_v32 = vld [vmem:[%s1087_s0 + $0x70] ss:$8 sps:$4 sm:$0xff]  }
   0xa   :  { %153 = vmatpush1.bf16.msra.mxu0 %v853_v3  ;;  %270 = vmatpush1.bf16.msra.mxu1 %v853_v3  ;;  %v681_v27 = vcombine.high %v673_v25, %v673_v25  ;;  %v680_v29 = vcombine.low %v673_v25, %v673_v25  ;;  %v794_v31 = vld [vmem:[%s1087_s0 + $0xac] ss:$8 sps:$4 sm:$0xff]   ;;  %v792_v33 = vld [vmem:[%s1087_s0 + $0xa8] ss:$8 sps:$4 sm:$0xff]   ;;  %v797_v35 = vld [vmem:[%s1087_s0 + $0xbc] ss:$8 sps:$4 sm:$0xff]  }
   0xb   :  { %154 = vmatprep.subr.bf16.mxu0 %v811_v0  ;;  %271 = vmatprep.subr.bf16.mxu1 %v811_v0  ;;  %v799_v36 = vld [vmem:[%s1087_s0 + $0x80] ss:$8 sps:$4 sm:$0xff]   ;;  %v801_v38 = vld [vmem:[%s1087_s0 + $0x94] ss:$8 sps:$4 sm:$0xff]   ;;  %v805_v42 = vld [vmem:[%s1087_s0 + $0x90] ss:$8 sps:$4 sm:$0xff]  }
   0xc   :  { %v800_v37 = vld [vmem:[%s1087_s0 + $0xb8] ss:$8 sps:$4 sm:$0xff]   ;;  %v803_v39 = vld [vmem:[%s1087_s0 + $0xcc] ss:$8 sps:$4 sm:$0xff]   ;;  %v806_v43 = vld [vmem:[%s1087_s0 + $0xc8] ss:$8 sps:$4 sm:$0xff]  }
   0xd   :  { %v692_v40 = vld [vmem:[%s1087_s0 + $0xa0] sm:$0x11]  ;;  %v711_v41 = vld [vmem:[%s1087_s0 + $0xd8] sm:$0x11] }
   0xe   :  { %155 = vmatpush1.bf16.msra.mxu0 %v862_v4  ;;  %272 = vmatpush1.bf16.msra.mxu1 %v862_v4  ;;  %v700_v44 = vcombine.high %v692_v40, %v692_v40  ;;  %v719_v45 = vcombine.high %v711_v41, %v711_v41  ;;  %v699_v46 = vcombine.low %v692_v40, %v692_v40 }
   0xf   :  { %156 = vmatprep.subr.bf16.mxu0 %v811_v0  ;;  %273 = vmatprep.subr.bf16.mxu1 %v811_v0  ;;  %v718_v47 = vcombine.low %v711_v41, %v711_v41 }
  0x12   :  { %157 = vmatpush1.bf16.msra.mxu0 %v878_v7  ;;  %274 = vmatpush1.bf16.msra.mxu1 %v878_v7 }
  0x13   :  { %158 = vmatprep.subr.bf16.mxu0 %v811_v0  ;;  %275 = vmatprep.subr.bf16.mxu1 %v811_v0 }
  0x16   :  { %159 = vmatpush1.bf16.msra.mxu0 %v888_v8  ;;  %276 = vmatpush1.bf16.msra.mxu1 %v888_v8 }
  0x17   :  { %160 = vmatprep.subr.bf16.mxu0 %v811_v0  ;;  %277 = vmatprep.subr.bf16.mxu1 %v811_v0 }
  0x1a   :  { %161 = vmatpush1.bf16.msra.mxu0 %v897_v9  ;;  %278 = vmatpush1.bf16.msra.mxu1 %v897_v9 }
  0x1b   :  { %162 = vmatprep.subr.bf16.mxu0 %v811_v0  ;;  %279 = vmatprep.subr.bf16.mxu1 %v811_v0 }
  0x1e   :  { %163 = vmatpush1.bf16.msra.mxu0 %v906_v10  ;;  %280 = vmatpush1.bf16.msra.mxu1 %v906_v10 }
  0x1f   :  { %164 = vmatprep.subr.bf16.mxu0 %v811_v0  ;;  %281 = vmatprep.subr.bf16.mxu1 %v811_v0 }
  0x22   :  { %165 = vmatpush1.bf16.msra.mxu0 %v915_v11  ;;  %282 = vmatpush1.bf16.msra.mxu1 %v915_v11 }
  0x23   :  { %166 = vmatprep.subr.bf16.mxu0 %v811_v0  ;;  %283 = vmatprep.subr.bf16.mxu1 %v811_v0 }
  0x26   :  { %167 = vmatpush1.bf16.msra.mxu0 %v926_v13  ;;  %284 = vmatpush1.bf16.msra.mxu1 %v926_v13 }
  0x27   :  { %389 = vmatprep.subr.bf16.mxu0 %v811_v0  ;;  %513 = vmatprep.subr.bf16.mxu1 %v811_v0 }
  0x29   :  { %181 = vmatmul.mubr.bf16.vlgmr.msra.gmra.mrb[0].mxu0 %v767_v14  ;;  %298 = vmatmul.mubr.bf16.vlgmr.msra.gmra.mrb[0].mxu1 %v770_v15 }
  0x2a   :  { %390 = vmatpush1.bf16.msra.mxu0 %v837_v1  ;;  %514 = vmatpush1.bf16.msra.mxu1 %v837_v1 }
  0x2b   :  { %391 = vmatprep.subr.bf16.mxu0 %v811_v0  ;;  %515 = vmatprep.subr.bf16.mxu1 %v811_v0 }
  0x2c   :  { %664 = vmatprep.mubr.msk.bf16.mxu0 %vm131_vm0, %v773_v16  ;;  %683 = vmatprep.mubr.msk.bf16.mxu1 %vm131_vm0, %v776_v17 }
  0x2e   :  { %392 = vmatpush1.bf16.msra.mxu0 %v844_v2  ;;  %516 = vmatpush1.bf16.msra.mxu1 %v844_v2 }
  0x2f   :  { %393 = vmatprep.subr.bf16.mxu0 %v811_v0  ;;  %517 = vmatprep.subr.bf16.mxu1 %v811_v0 }
  0x31   :  { %189 = vmatmul.mubr.bf16.gmra.mrb[4].mxu0 %v775_v18  ;;  %306 = vmatmul.mubr.bf16.gmra.mrb[4].mxu1 %v778_v19 }
  0x32   :  { %394 = vmatpush1.bf16.msra.mxu0 %v853_v3  ;;  %518 = vmatpush1.bf16.msra.mxu1 %v853_v3 }
  0x33   :  { %395 = vmatprep.subr.bf16.mxu0 %v811_v0  ;;  %519 = vmatprep.subr.bf16.mxu1 %v811_v0 }
  0x34   :  { %665 = vmatprep.mubr.msk.bf16.mxu0 %vm131_vm0, %v779_v20  ;;  %684 = vmatprep.mubr.msk.bf16.mxu1 %vm131_vm0, %v782_v21 }
  0x36   :  { %396 = vmatpush1.bf16.msra.mxu0 %v862_v4  ;;  %520 = vmatpush1.bf16.msra.mxu1 %v862_v4 }
  0x37   :  { %397 = vmatprep.subr.bf16.mxu0 %v811_v0  ;;  %521 = vmatprep.subr.bf16.mxu1 %v811_v0 }
  0x39   :  { %197 = vmatmul.mubr.bf16.gmra.mrb[8].mxu0 %v781_v22  ;;  %314 = vmatmul.mubr.bf16.gmra.mrb[8].mxu1 %v784_v23 }
  0x3a   :  { %398 = vmatpush1.bf16.msra.mxu0 %v878_v7  ;;  %522 = vmatpush1.bf16.msra.mxu1 %v878_v7 }
  0x3b   :  { %399 = vmatprep.subr.bf16.mxu0 %v811_v0  ;;  %523 = vmatprep.subr.bf16.mxu1 %v811_v0 }
  0x3c   :  { %666 = vmatprep.mubr.msk.bf16.mxu0 %vm131_vm0, %v652_v26  ;;  %685 = vmatprep.mubr.msk.bf16.mxu1 %vm131_vm0, %v681_v27 }
  0x3e   :  { %400 = vmatpush1.bf16.msra.mxu0 %v888_v8  ;;  %524 = vmatpush1.bf16.msra.mxu1 %v888_v8 }
  0x3f   :  { %401 = vmatprep.subr.bf16.mxu0 %v811_v0  ;;  %525 = vmatprep.subr.bf16.mxu1 %v811_v0 }
  0x41   :  { %205 = vmatmul.mubr.bf16.gmra.mrb[12].mxu0 %v651_v28  ;;  %322 = vmatmul.mubr.bf16.gmra.mrb[12].mxu1 %v680_v29  ;;  %v724_v28 = vld [vmem:[%s1088_s2] ss:$0 sm:$0xff] }
  0x42   :  { %402 = vmatpush1.bf16.msra.mxu0 %v897_v9  ;;  %526 = vmatpush1.bf16.msra.mxu1 %v897_v9 }
  0x43   :  { %403 = vmatprep.subr.bf16.mxu0 %v811_v0  ;;  %527 = vmatprep.subr.bf16.mxu1 %v811_v0 }
  0x44   :  { %701 = vmatprep.mubr.msk.bf16.mxu0 %vm131_vm0, %v791_v30  ;;  %720 = vmatprep.mubr.msk.bf16.mxu1 %vm131_vm0, %v794_v31 }
  0x46   :  { %404 = vmatpush1.bf16.msra.mxu0 %v906_v10  ;;  %528 = vmatpush1.bf16.msra.mxu1 %v906_v10 }
  0x47   :  { %405 = vmatprep.subr.bf16.mxu0 %v811_v0  ;;  %529 = vmatprep.subr.bf16.mxu1 %v811_v0 }
  0x4a   :  { %406 = vmatpush1.bf16.msra.mxu0 %v915_v11  ;;  %530 = vmatpush1.bf16.msra.mxu1 %v915_v11 }
  0x4b   :  { %407 = vmatprep.subr.bf16.mxu0 %v811_v0  ;;  %531 = vmatprep.subr.bf16.mxu1 %v811_v0 }
  0x4e   :  { %408 = vmatpush1.bf16.msra.mxu0 %v926_v13  ;;  %532 = vmatpush1.bf16.msra.mxu1 %v926_v13 }
  0x51   :  { %422 = vmatmul.mubr.bf16.vlgmr.msra.gmra.mrb[16].mxu0 %v789_v32  ;;  %546 = vmatmul.mubr.bf16.vlgmr.msra.gmra.mrb[16].mxu1 %v792_v33 }
  0x52   :  { %702 = vmatprep.mubr.msk.bf16.mxu0 %vm131_vm0, %v795_v34  ;;  %721 = vmatprep.mubr.msk.bf16.mxu1 %vm131_vm0, %v797_v35 }
  0x59   :  { %430 = vmatmul.mubr.bf16.gmra.mrb[20].mxu0 %v799_v36  ;;  %554 = vmatmul.mubr.bf16.gmra.mrb[20].mxu1 %v800_v37 }
  0x5a   :  { %703 = vmatprep.mubr.msk.bf16.mxu0 %vm131_vm0, %v801_v38  ;;  %722 = vmatprep.mubr.msk.bf16.mxu1 %vm131_vm0, %v803_v39 }
  0x61   :  { %438 = vmatmul.mubr.bf16.gmra.mrb[24].mxu0 %v805_v42  ;;  %562 = vmatmul.mubr.bf16.gmra.mrb[24].mxu1 %v806_v43 }
  0x62   :  { %704 = vmatprep.mubr.msk.bf16.mxu0 %vm131_vm0, %v700_v44  ;;  %723 = vmatprep.mubr.msk.bf16.mxu1 %vm131_vm0, %v719_v45 }
  0x69   :  { %446 = vmatmul.mubr.bf16.gmra.mrb[28].mxu0 %v699_v46  ;;  %570 = vmatmul.mubr.bf16.gmra.mrb[28].mxu1 %v718_v47 }
  0xfc   :  { %v182_v48 = vpop.f32.mrb[0].mxu0  ;;  %v299_v49 = vpop.f32.mrb[0].mxu1 }
  0xfd   :  { %v329_v50 = vmax.f32 %v182_v48, %v299_v49  ;;  %v184_v51 = vpop.f32.mrb[1].mxu0  ;;  %v301_v52 = vpop.f32.mrb[1].mxu1 }
  0xfe   :  { %v185_v53 = vpop.f32.mrb[2].mxu0  ;;  %v302_v54 = vpop.f32.mrb[2].mxu1 }
  0xff   :  { %v330_v55 = vmax.f32 %v185_v53, %v302_v54  ;;  %v187_v56 = vpop.f32.mrb[3].mxu0  ;;  %v304_v57 = vpop.f32.mrb[3].mxu1 }
 0x104   :  { %v190_v58 = vpop.f32.mrb[4].mxu0  ;;  %v307_v59 = vpop.f32.mrb[4].mxu1 }
 0x105   :  { %v192_v60 = vpop.f32.mrb[5].mxu0  ;;  %v331_v61 = vmax.f32 %v190_v58, %v307_v59  ;;  %v309_v62 = vpop.f32.mrb[5].mxu1 }
 0x106   :  { %v193_v63 = vpop.f32.mrb[6].mxu0  ;;  %v310_v0 = vpop.f32.mrb[6].mxu1 }
 0x107   :  { %v195_v1 = vpop.f32.mrb[7].mxu0  ;;  %v332_v2 = vmax.f32 %v193_v63, %v310_v0  ;;  %v312_v3 = vpop.f32.mrb[7].mxu1 }
 0x10c   :  { %v198_v4 = vpop.f32.mrb[8].mxu0  ;;  %v315_v5 = vpop.f32.mrb[8].mxu1 }
 0x10d   :  { %v200_v6 = vpop.f32.mrb[9].mxu0  ;;  %v333_v7 = vmax.f32 %v198_v4, %v315_v5  ;;  %v317_v8 = vpop.f32.mrb[9].mxu1 }
 0x10e   :  { %v201_v9 = vpop.f32.mrb[10].mxu0  ;;  %v318_v10 = vpop.f32.mrb[10].mxu1 }
 0x10f   :  { %v203_v11 = vpop.f32.mrb[11].mxu0  ;;  %v334_v12 = vmax.f32 %v201_v9, %v318_v10  ;;  %v320_v13 = vpop.f32.mrb[11].mxu1 }
 0x114   :  { %v1062_v14 = vpop.f32.mrb[12].mxu0  ;;  %v1064_v15 = vpop.f32.mrb[12].mxu1 }
 0x115   :  { %v208_v16 = vpop.f32.mrb[13].mxu0  ;;  %v335_v17 = vmax.f32 %v1062_v14, %v1064_v15  ;;  %v325_v18 = vpop.f32.mrb[13].mxu1 }
 0x116   :  { %v209_v19 = vpop.f32.mrb[14].mxu0  ;;  %v326_v20 = vpop.f32.mrb[14].mxu1 }
 0x117   :  { %v210_v21 = vpop.f32.mrb[15].mxu0  ;;  %v327_v22 = vpop.f32.mrb[15].mxu1 }
 0x124   :  { %v423_v23 = vpop.f32.mrb[16].mxu0  ;;  %v547_v24 = vpop.f32.mrb[16].mxu1 }
 0x125   :  { %v453_v25 = vmax.f32 %v329_v50, %v423_v23  ;;  %v425_v26 = vpop.f32.mrb[17].mxu0  ;;  %v549_v27 = vpop.f32.mrb[17].mxu1 }
 0x126   :  { %v426_v29 = vpop.f32.mrb[18].mxu0  ;;  %v550_v30 = vpop.f32.mrb[18].mxu1 }
 0x127   :  { %v577_v31 = vmax.f32 %v453_v25, %v547_v24  ;;  %v454_v32 = vmax.f32 %v330_v55, %v426_v29  ;;  %v428_v33 = vpop.f32.mrb[19].mxu0  ;;  %v552_v34 = vpop.f32.mrb[19].mxu1 }
 0x129   :  { %v591_v35 = vadd.f32 %v724_v28, %v577_v31  ;;  %v578_v36 = vmax.f32 %v454_v32, %v550_v30 }
 0x12b   :  { %v592_v37 = vadd.f32 %v724_v28, %v578_v36  ;;  %v598_v40 = vmax.f32 %v591_v35, 0.0 }
 0x12c   :  { %v431_v38 = vpop.f32.mrb[20].mxu0  ;;  %v555_v39 = vpop.f32.mrb[20].mxu1 }
 0x12d   :  { %v599_v41 = vmax.f32 %v592_v37, 0.0  ;;  %v455_v42 = vmax.f32 %v331_v61, %v431_v38  ;;  %v433_v43 = vpop.f32.mrb[21].mxu0  ;;  %v557_v44 = vpop.f32.mrb[21].mxu1 }
 0x12e   :  { %v434_v45 = vpop.f32.mrb[22].mxu0  ;;  %v558_v46 = vpop.f32.mrb[22].mxu1 }
 0x12f   :  { %v742_v47 = vpack.c.bf16 %v599_v41, %v598_v40  ;;  %v579_v48 = vmax.f32 %v455_v42, %v555_v39  ;;  %v456_v49 = vmax.f32 %v332_v2, %v434_v45  ;;  %v436_v50 = vpop.f32.mrb[23].mxu0  ;;  %v560_v51 = vpop.f32.mrb[23].mxu1 }
 0x131   :  { %743 = vst [vmem:[%s1089_s3] sm:$0xff] %v742_v47   ;;  %v593_v52 = vadd.f32 %v724_v28, %v579_v48  ;;  %v580_v53 = vmax.f32 %v456_v49, %v558_v46 }
 0x133   :  { %v594_v54 = vadd.f32 %v724_v28, %v580_v53  ;;  %v600_v57 = vmax.f32 %v593_v52, 0.0 }
 0x134   :  { %v439_v55 = vpop.f32.mrb[24].mxu0  ;;  %v563_v56 = vpop.f32.mrb[24].mxu1 }
 0x135   :  { %v601_v58 = vmax.f32 %v594_v54, 0.0  ;;  %v457_v59 = vmax.f32 %v333_v7, %v439_v55  ;;  %v441_v60 = vpop.f32.mrb[25].mxu0  ;;  %v565_v61 = vpop.f32.mrb[25].mxu1 }
 0x136   :  { %v442_v62 = vpop.f32.mrb[26].mxu0  ;;  %v566_v63 = vpop.f32.mrb[26].mxu1 }
 0x137   :  { %v747_v0 = vpack.c.bf16 %v601_v58, %v600_v57  ;;  %v581_v1 = vmax.f32 %v457_v59, %v563_v56  ;;  %v458_v2 = vmax.f32 %v334_v12, %v442_v62  ;;  %v444_v3 = vpop.f32.mrb[27].mxu0  ;;  %v568_v4 = vpop.f32.mrb[27].mxu1 }
 0x139   :  { %754 = vst [vmem:[%s1089_s3 + $0x8] sm:$0xff] %v747_v0   ;;  %v595_v5 = vadd.f32 %v724_v28, %v581_v1  ;;  %v582_v6 = vmax.f32 %v458_v2, %v566_v63 }
 0x13b   :  { %v596_v8 = vadd.f32 %v724_v28, %v582_v6  ;;  %v602_v11 = vmax.f32 %v595_v5, 0.0 }
 0x13c   :  { %v447_v9 = vpop.f32.mrb[28].mxu0  ;;  %v571_v10 = vpop.f32.mrb[28].mxu1 }
 0x13d   :  { %v603_v7 = vmax.f32 %v596_v8, 0.0  ;;  %v459_v13 = vmax.f32 %v335_v17, %v447_v9  ;;  %v449_v16 = vpop.f32.mrb[29].mxu0  ;;  %v573_v18 = vpop.f32.mrb[29].mxu1 }
 0x13e   :  { %v450_v12 = vpop.f32.mrb[30].mxu0  ;;  %v574_v19 = vpop.f32.mrb[30].mxu1 }
 0x13f   :  { %v752_v20 = vpack.c.bf16 %v603_v7, %v602_v11  ;;  %v583_v21 = vmax.f32 %v459_v13, %v571_v10  ;;  %v451_v22 = vpop.f32.mrb[31].mxu0  ;;  %v575_v23 = vpop.f32.mrb[31].mxu1 }
 0x141   :  { %755 = vst [vmem:[%s1089_s3 + $0x10] sm:$0xff] %v752_v20   ;;  %v597_v24 = vadd.f32 %v724_v28, %v583_v21 }
 0x143   :  { %v604_v25 = vmax.f32 %v597_v24, 0.0 }
 0x145   :  { %v738_v26 = vpack.c.bf16 %v604_v25, %v604_v25 }
 0x147   :  { %640 = vst [vmem:[%s1089_s3 + $0x18] sm:$0x1] %v738_v26 }

// kernel: lenet_forward.5
= control target key start
LH: loop header
LB: loop body
LE: loop exit
PB: predicated region body
PF: predicated region fallthrough
CT: control target
= control target key end

     0   :  { %v786_v1 = vmov 0   ;;  %v98_v20 = vlaneseq  ;;  %v787_v25 = vmov 1966171168   ;;  %vm264_vm0 = vcmask 130048   ;;  %s1005_s0 = inlined_call_operand.vmem [shape: bf16[2,400], index: 0, kind: input, shape index: {}]   ;;  %s1006_s1 = inlined_call_operand.vmem [shape: bf16[400,128], index: 1, kind: input, shape index: {}]   ;;  %s1007_s2 = inlined_call_operand.vmem [shape: f32[1,128], index: 2, kind: input, shape index: {}]   ;;  %s1008_s3 = inlined_call_operand.vmem [shape: bf16[128,128], index: 3, kind: input, shape index: {}]   ;;  %s1009_s4 = inlined_call_operand.vmem [shape: f32[1,128], index: 4, kind: input, shape index: {}]   ;;  %s1010_s5 = inlined_call_operand.vmem [shape: bf16[128,10], index: 5, kind: input, shape index: {}]   ;;  %s1011_s6 = inlined_call_operand.vmem [shape: f32[1,10], index: 6, kind: input, shape index: {}]   ;;  %s1012_s7 = inlined_call_operand.hbm [shape: f32[2,10], index: 7, kind: output, shape index: {}]  }
   0x1   :  { %v721_v0 = vld [vmem:[%s1006_s1 + $0x40] sm:$0xff]   ;;  %308 = vmatprep.subr.bf16.mxu1 %v786_v1  ;;  %v724_v4 = vld [vmem:[%s1006_s1 + $0x48] sm:$0xff]   ;;  %v727_v7 = vld [vmem:[%s1006_s1 + $0x50] sm:$0xff]   ;;  %v96_v26 = vunpack.c.l.s4 %v787_v25  ;;  %v788_v38 = vmov 0.0  }
   0x2   :  { %v722_v2 = vld [vmem:[%s1006_s1 + $0x80] sm:$0xff]   ;;  %636 = vmatprep.subr.bf16.mxu0 %v721_v0  ;;  %v725_v5 = vld [vmem:[%s1006_s1 + $0x88] sm:$0xff]   ;;  %v728_v8 = vld [vmem:[%s1006_s1 + $0x90] sm:$0xff]   ;;  %v99_v27 = vshrl.u32 %v98_v20, 7 }
   0x3   :  { %v723_v3 = vld [vmem:[%s1006_s1] sm:$0xff]   ;;  %309 = vmatpush1.bf16.msra.mxu1 %v722_v2  ;;  %v726_v6 = vld [vmem:[%s1006_s1 + $0x8] sm:$0xff]   ;;  %v729_v9 = vld [vmem:[%s1006_s1 + $0x10] sm:$0xff]   ;;  %v97_v30 = vunpack.c.0.s8 %v96_v26 }
   0x4   :  { %637 = vmatpush3.bf16.msra.mxu0 %v723_v3  ;;  %310 = vmatprep.subr.bf16.mxu1 %v786_v1  ;;  %v730_v10 = vld [vmem:[%s1006_s1 + $0x58] sm:$0xff]   ;;  %v733_v13 = vld [vmem:[%s1006_s1 + $0x60] sm:$0xff]   ;;  %v736_v16 = vld [vmem:[%s1006_s1 + $0x68] sm:$0xff]  }
   0x5   :  { %638 = vmatprep.subr.bf16.mxu0 %v724_v4  ;;  %v731_v11 = vld [vmem:[%s1006_s1 + $0x98] sm:$0xff]   ;;  %v734_v14 = vld [vmem:[%s1006_s1 + $0xa0] sm:$0xff]   ;;  %v737_v17 = vld [vmem:[%s1006_s1 + $0xa8] sm:$0xff]   ;;  %v100_v32 = vsub.s32 %v97_v30, %v99_v27 }
   0x6   :  { %v732_v12 = vld [vmem:[%s1006_s1 + $0x18] sm:$0xff]   ;;  %v735_v15 = vld [vmem:[%s1006_s1 + $0x20] sm:$0xff]   ;;  %v738_v18 = vld [vmem:[%s1006_s1 + $0x28] sm:$0xff]  }
   0x7   :  { %311 = vmatpush1.bf16.msra.mxu1 %v725_v5  ;;  %v739_v19 = vld [vmem:[%s1006_s1 + $0x70] sm:$0xff]   ;;  %v591_v23 = vld.sshfl [vmem:[%s1005_s0] sm:$0x33 pattern:$0x75316420]  ;;  %v742_v24 = vld [vmem:[%s1006_s1 + $0x78] sm:$0xff]  }
   0x8   :  { %639 = vmatpush3.bf16.msra.mxu0 %v726_v6  ;;  %312 = vmatprep.subr.bf16.mxu1 %v786_v1  ;;  %v740_v21 = vld [vmem:[%s1006_s1 + $0xb0] sm:$0xff]   ;;  %v743_v28 = vld [vmem:[%s1006_s1 + $0xb8] sm:$0xff]   ;;  %v94_v29 = vcombine.high %v591_v23, %v591_v23  ;;  %v745_v33 = vld [vmem:[%s1006_s1 + $0xc0] sm:$0xff]   ;;  %v101_v36 = vrot.slane %v591_v23, %v100_v32 }
   0x9   :  { %640 = vmatprep.subr.bf16.mxu0 %v727_v7  ;;  %v741_v22 = vld [vmem:[%s1006_s1 + $0x30] sm:$0xff]   ;;  %v744_v31 = vld [vmem:[%s1006_s1 + $0x38] sm:$0xff]   ;;  %v746_v34 = vld [vmem:[%s1008_s3] sm:$0xff]  }
   0xa   :  { %v108_v35 = vrot.slane %v94_v29, %v100_v32  ;;  %v109_v39 = vcombine.high %v101_v36, %v101_v36  ;;  %v747_v40 = vld [vmem:[%s1008_s3 + $0x8] sm:$0xff]  }
   0xb   :  { %313 = vmatpush1.bf16.msra.mxu1 %v728_v8 }
   0xc   :  { %641 = vmatpush3.bf16.msra.mxu0 %v729_v9  ;;  %314 = vmatprep.subr.bf16.mxu1 %v786_v1  ;;  %v110_v37 = vcombine.high %v108_v35, %v108_v35 }
   0xd   :  { %642 = vmatprep.subr.bf16.mxu0 %v730_v10  ;;  %300 = vmatprep.mubr.bf16.mxu0 %v108_v35 }
   0xe   :  { %617 = vmatprep.mubr.msk.bf16.mxu1 %vm264_vm0, %v110_v37 }
   0xf   :  { %315 = vmatpush1.bf16.msra.mxu1 %v731_v11 }
  0x10   :  { %643 = vmatpush3.bf16.msra.mxu0 %v732_v12  ;;  %316 = vmatprep.subr.bf16.mxu1 %v786_v1 }
  0x11   :  { %644 = vmatprep.subr.bf16.mxu0 %v733_v13 }
  0x13   :  { %317 = vmatpush1.bf16.msra.mxu1 %v734_v14 }
  0x14   :  { %645 = vmatpush3.bf16.msra.mxu0 %v735_v15  ;;  %318 = vmatprep.subr.bf16.mxu1 %v786_v1 }
  0x15   :  { %646 = vmatprep.subr.bf16.mxu0 %v736_v16 }
  0x17   :  { %319 = vmatpush1.bf16.msra.mxu1 %v737_v17 }
  0x18   :  { %647 = vmatpush3.bf16.msra.mxu0 %v738_v18  ;;  %320 = vmatprep.subr.bf16.mxu1 %v786_v1 }
  0x19   :  { %648 = vmatprep.subr.bf16.mxu0 %v739_v19 }
  0x1b   :  { %321 = vmatpush1.bf16.msra.mxu1 %v740_v21 }
  0x1c   :  { %649 = vmatpush3.bf16.msra.mxu0 %v741_v22  ;;  %322 = vmatprep.subr.bf16.mxu1 %v786_v1 }
  0x1d   :  { %650 = vmatprep.subr.bf16.mxu0 %v742_v24 }
  0x1f   :  { %323 = vmatpush1.bf16.msra.mxu1 %v743_v28 }
  0x20   :  { %651 = vmatpush3.bf16.msra.mxu0 %v744_v31  ;;  %324 = vmatprep.subr.bf16.mxu1 %v786_v1 }
  0x21   :  { %676 = vmatprep.subr.bf16.mxu0 %v788_v38 }
  0x23   :  { %301 = vmatmul.mubr.bf16.vlgmr.msra.gmra.mrb[0].mxu0 %v101_v36  ;;  %325 = vmatpush1.bf16.msra.mxu1 %v745_v33 }
  0x24   :  { %677 = vmatpush3.bf16.msra.mxu0 %v746_v34  ;;  %696 = vmatprep.subr.bf16.mxu1 %v788_v38 }
  0x25   :  { %678 = vmatprep.subr.bf16.mxu0 %v788_v38 }
  0x26   :  { %341 = vmatmul.mubr.bf16.vlgmr.msra.gmra.mrb[0].mxu1 %v109_v39 }
  0x27   :  { %12 = vsyncpa [#allocation3], 0  ;;  %v748_v41 = vld [vmem:[%s1008_s3 + $0x10] sm:$0xff]   ;;  %v749_v42 = vld [vmem:[%s1008_s3 + $0x18] sm:$0xff]   ;;  %vm789_vm1 = vmmov 0   ;;  %s790_s16 = smov [#allocation2]  }
  0x28   :  { %679 = vmatpush3.bf16.msra.mxu0 %v747_v40  ;;  %v750_v43 = vld [vmem:[%s1008_s3 + $0x20] sm:$0xff]   ;;  %v751_v44 = vld [vmem:[%s1008_s3 + $0x28] sm:$0xff]   ;;  %v752_v45 = vld [vmem:[%s1008_s3 + $0x30] sm:$0xff]   ;;  %692 = vmatprep.mubr.msk.bf16.mxu0 %vm789_vm1, %v788_v38  ;;  %s582_s17 = sshll.u32 %s790_s16, 4  ;;  %vm574_vm2 = vcmask 74752   ;;  %s583_s17 = int_to_ptr.vmem [resolvable:$true] %s582_s17 }
  0x29   :  { %680 = vmatprep.subr.bf16.mxu0 %v788_v38  ;;  %v753_v46 = vld [vmem:[%s1008_s3 + $0x38] sm:$0xff]   ;;  %712 = vmatprep.mubr.msk.bf16.mxu1 %vm789_vm1, %v788_v38  ;;  %v754_v47 = vld [vmem:[%s1010_s5] sm:$0xff]   ;;  %v755_v48 = vld [vmem:[%s1010_s5 + $0x8] sm:$0xff]   ;;  %p767_p1 = scmp.lt.s32.totalorder %s583_s17, %s583_s17 }
  0x2a   :  { %697 = vmatpush3.bf16.msra.mxu1 %v754_v47  ;;  %v756_v49 = vld [vmem:[%s1010_s5 + $0x10] sm:$0xff]   ;;  %v757_v50 = vld [vmem:[%s1010_s5 + $0x18] sm:$0xff]   ;;  %v758_v51 = vld [vmem:[%s1010_s5 + $0x20] sm:$0xff]  }
  0x2b   :  { %698 = vmatprep.subr.bf16.mxu1 %v788_v38  ;;  %v759_v52 = vld [vmem:[%s1010_s5 + $0x28] sm:$0xff]   ;;  %v590_v55 = vld [vmem:[%s1007_s2] ss:$0 sm:$0xff]  ;;  %v760_v3 = vld [vmem:[%s1010_s5 + $0x30] sm:$0xff]  }
  0x2c   :  { %681 = vmatpush3.bf16.msra.mxu0 %v748_v41  ;;  %v761_v4 = vld [vmem:[%s1010_s5 + $0x38] sm:$0xff]   ;;  %v618_v5 = vld [vmem:[%s1009_s4] ss:$0 sm:$0xff]  ;;  %s762_s4 = scalar_lea.vmem %s583_s17, 32 }
  0x2d   :  { %682 = vmatprep.subr.bf16.mxu0 %v788_v38  ;;  %v627_v13 = vld [vmem:[%s1011_s6] ss:$0 sm:$0xff]  ;;  %p763_p0 = scmp.ne.s32.totalorder %s583_s17, %s762_s4  ;;  %p768_p2 = scmp.lt.s32.totalorder %s762_s4, %s762_s4 }
  0x2e   :  { %699 = vmatpush3.bf16.msra.mxu1 %v755_v48 }
  0x2f   :  { %700 = vmatprep.subr.bf16.mxu1 %v788_v38  ;;  %p769_p3 = por %p768_p2, %p767_p1 }
  0x30   :  { %683 = vmatpush3.bf16.msra.mxu0 %v749_v42 }
  0x31   :  { %684 = vmatprep.subr.bf16.mxu0 %v788_v38  ;;  %p770_p4 = pnand %p769_p3, %p763_p0 }
  0x32   :  { %701 = vmatpush3.bf16.msra.mxu1 %v756_v49 }
  0x33   :  { %702 = vmatprep.subr.bf16.mxu1 %v788_v38 }
  0x34   :  { %685 = vmatpush3.bf16.msra.mxu0 %v750_v43 }
  0x35   :  { %686 = vmatprep.subr.bf16.mxu0 %v788_v38 }
  0x36   :  { %703 = vmatpush3.bf16.msra.mxu1 %v757_v50 }
  0x37   :  { %704 = vmatprep.subr.bf16.mxu1 %v788_v38 }
  0x38   :  { %687 = vmatpush3.bf16.msra.mxu0 %v751_v44 }
  0x39   :  { %688 = vmatprep.subr.bf16.mxu0 %v788_v38 }
  0x3a   :  { %705 = vmatpush3.bf16.msra.mxu1 %v758_v51 }
  0x3b   :  { %706 = vmatprep.subr.bf16.mxu1 %v788_v38 }
  0x3c   :  { %689 = vmatpush3.bf16.msra.mxu0 %v752_v45 }
  0x3d   :  { %690 = vmatprep.subr.bf16.mxu0 %v788_v38 }
  0x3e   :  { %707 = vmatpush3.bf16.msra.mxu1 %v759_v52 }
  0x3f   :  { %708 = vmatprep.subr.bf16.mxu1 %v788_v38 }
  0x40   :  { %691 = vmatpush3.bf16.msra.mxu0 %v753_v46 }
  0x42   :  { %709 = vmatpush3.bf16.msra.mxu1 %v760_v3 }
  0x43   :  { %710 = vmatprep.subr.bf16.mxu1 %v788_v38 }
  0x46   :  { %711 = vmatpush3.bf16.msra.mxu1 %v761_v4 }
  0xf6   :  { %v652_v53 = vpop.f32.mrb[0].mxu0 }
  0xf7   :  { %v653_v54 = vpop.f32.mrb[1].mxu0 }
  0xf8   :  { %v654_v56 = vadd.f32 %v653_v54, %v652_v53  ;;  %v655_v57 = vpop.f32.mrb[2].mxu0 }
  0xf9   :  { %v656_v58 = vpop.f32.mrb[3].mxu0  ;;  %v342_v59 = vpop.f32.mrb[0].mxu1 }
  0xfa   :  { %v303_v60 = vadd.f32 %v654_v56, %v590_v55  ;;  %v344_v61 = vpop.f32.mrb[1].mxu1 }
  0xfb   :  { %v345_v62 = vpop.f32.mrb[2].mxu1 }
  0xfc   :  { %v343_v63 = vadd.f32 %v342_v59, %v303_v60  ;;  %v346_v0 = vpop.f32.mrb[3].mxu1 }
  0xfe   :  { %v348_v1 = vmax.f32 %v343_v63, 0.0 }
 0x100   :  { %v349_v2 = vpack.c.bf16 %v348_v1, %v348_v1 }
 0x102   :  { %693 = vmatmul.mubr.bf16.vlgmr.msra.gmra.mrb[4].mxu0 %v349_v2 }
 0x1d5   :  { %v455_v6 = vpop.f32.mrb[4].mxu0 }
 0x1d6   :  { %v456_v7 = vadd.f32 %v618_v5, %v455_v6  ;;  %v694_v8 = vpop.f32.mrb[5].mxu0 }
 0x1d7   :  { %v458_v9 = vpop.f32.mrb[6].mxu0 }
 0x1d8   :  { %v461_v10 = vmax.f32 %v456_v7, 0.0  ;;  %v695_v11 = vpop.f32.mrb[7].mxu0 }
 0x1da   :  { %v462_v12 = vpack.c.bf16 %v461_v10, %v461_v10 }
 0x1dc   :  { %713 = vmatmul.mubr.bf16.vlgmr.msra.gmra.mrb[4].mxu1 %v462_v12 }
 0x2af   :  { %v568_v14 = vpop.f32.mrb[4].mxu1 }
 0x2b0   :  { %v569_v15 = vadd.f32 %v627_v13, %v568_v14  ;;  %v714_v16 = vpop.f32.mrb[5].mxu1 }
 0x2b1   :  { %v571_v17 = vpop.f32.mrb[6].mxu1 }
 0x2b2   :  { %v715_v18 = vpop.f32.mrb[7].mxu1  ;;  %575 = vst.msk [vmem:[#allocation2] sm:$0x3] %vm574_vm2, %v569_v15 }
 0x2b3   :  { %773 = shalt.err (!%p770_p4)
}
 0x2b4   :  { %s774_s6 = scalar_lea.hbm %s1012_s7, 32 }
 0x2b5   :  { %p775_p5 = scmp.ne.s32.totalorder %s1012_s7, %s774_s6  ;;  %p778_p6 = scmp.lt.u32.totalorder %s774_s6, %s1012_s7 }
 0x2b7   :  { %p780_p7 = pnand %p778_p6, %p775_p5 }
 0x2b9   :  { %783 = shalt.err (!%p780_p7)
}
 0x2ba   :  { %585 = dma.vmem_to_hbm [thread:$0]  %s583_s17, 32, %s1012_s7, [#allocation3]  }
 0x2bb   :  { %784 = dma.done.wait [#allocation3], 32  }
 0x2bc   :  { %785 = vsyncadd [#allocation3], 4294967264 }
 0x2bd   :  { %589 = vsyncpa [#allocation3], 1 }

</bundles_post_ra>
